<compile_context>
chip_gen: v6e
topology: v6e:2x2x1
jax: 0.10.0
libtpu: 0.0.40
codegen_flags: <defaults>
</compile_context>

<pallas_src>
import functools

import jax
import jax.numpy as jnp
from jax.experimental import pallas as pl
from jax.experimental.pallas import tpu as pltpu

C_PAD = 128   # lane-padded channel width for every activation / weight
SUB = 8       # sublane granularity
G_PAD = 8     # padded graphs-per-block (rows of the readout)


def _round_up(x, m):
    return ((x + m - 1) // m) * m


def _pad2(a, rows, cols):
    out = jnp.zeros((rows, cols), jnp.float32)
    return out.at[: a.shape[0], : a.shape[1]].set(a.astype(jnp.float32))


# ----------------------------------------------------------------------------
# Fused kernel (one grid step == one independent batched graph):
#   embedding lookup + n_iter x (WL aggregate -> MLP -> fused masked BatchNorm)
#   + graph-mean readout + 3-layer MLPReadout.
# ----------------------------------------------------------------------------
def _make_fused_kernel(n_iter, n_mlp_layer, t_pad):
    def kernel(ids_ref, mask_ref, adj_ref, member_ref, embed_ref,
               w_ref, b_ref, gamma_ref, beta_ref, rw_ref, rb_ref, o_ref):
        n_nodes = adj_ref.shape[1]

        ids = ids_ref[0]                                   # (N, 1) i32
        mask = mask_ref[0]                                 # (N, 1) f32, 1=valid
        adj = adj_ref[0]                                   # (N, N) bf16

        n_valid = jnp.sum(mask)                            # true node count
        inv_n = 1.0 / n_valid

        # --- embedding lookup: in-kernel one-hot (bf16) -> MXU ---------------
        cols = jax.lax.broadcasted_iota(jnp.int32, (n_nodes, t_pad), 1)
        onehot = (cols == ids).astype(jnp.bfloat16)        # (N, T_pad)
        h = jnp.dot(onehot, embed_ref[...],
                    preferred_element_type=jnp.float32)    # (N, 128) f32
        h_bf = h.astype(jnp.bfloat16)

        # --- WLS layers -------------------------------------------------------
        li = 0
        for t in range(n_iter):
            # WL / GIN-style aggregation:  h + A @ h   (eps = 0), bf16 on MXU
            z = h + jnp.dot(adj, h_bf, preferred_element_type=jnp.float32)
            # MLP: n_mlp_layer linears, ReLU between (none after the last)
            for m in range(n_mlp_layer):
                z = jnp.dot(z.astype(jnp.bfloat16), w_ref[li],
                            preferred_element_type=jnp.float32) + b_ref[li]
                if m < n_mlp_layer - 1:
                    z = jnp.maximum(z, 0.0)
                li += 1
            # Fused, masked BatchNorm1d (training-mode batch stats, eps=1e-5):
            # single sweep -> colsum(z*mask), colsum(z*z*mask); padded node
            # rows are excluded and the divisor is the true node count.
            zm = z * mask
            s1 = jnp.sum(zm, axis=0, keepdims=True)        # (1, 128)
            s2 = jnp.sum(zm * z, axis=0, keepdims=True)    # (1, 128)
            mean = s1 * inv_n
            var = jnp.maximum(s2 * inv_n - mean * mean, 0.0)
            a = gamma_ref[t] * jax.lax.rsqrt(var + 1e-5)
            shift = beta_ref[t] - mean * a
            h = z * a + shift                              # f32
            h_bf = h.astype(jnp.bfloat16)

        # --- dgl.mean_nodes == row-normalized membership @ h -----------------
        g = jnp.dot(member_ref[0], h_bf,
                    preferred_element_type=jnp.float32)    # (G_pad, 128)

        # --- MLPReadout: out_dim -> out_dim//2 -> out_dim//4 -> 1 (padded) ---
        y = jnp.dot(g.astype(jnp.bfloat16), rw_ref[0],
                    preferred_element_type=jnp.float32) + rb_ref[0]
        y = jnp.maximum(y, 0.0)
        y = jnp.dot(y.astype(jnp.bfloat16), rw_ref[1],
                    preferred_element_type=jnp.float32) + rb_ref[1]
        y = jnp.maximum(y, 0.0)
        y = jnp.dot(y.astype(jnp.bfloat16), rw_ref[2],
                    preferred_element_type=jnp.float32) + rb_ref[2]

        o_ref[0] = y.astype(o_ref.dtype)                   # (G_pad, 128)

    return kernel


def _block_spec(shape):
    # per-block input: leading axis indexed by the grid, rest full extent
    return pl.BlockSpec((1,) + tuple(shape[1:]), lambda i: (i, 0, 0))


def _const_spec(shape):
    # weights: constant block index across the grid -> stay resident in VMEM
    nd = len(shape)
    return pl.BlockSpec(tuple(shape), lambda i, _nd=nd: (0,) * _nd)


@functools.partial(jax.jit, static_argnames=("n_iter", "n_mlp_layer"))
def fused_forward(weights, ids_blk, mask_blk, adj_blk, member_blk,
                  *, n_iter, n_mlp_layer):
    """Full WLSMLPNetZINC forward over a batch of independent blocks.

    Returns an array of shape [num_blocks, G_PAD, 128]; the prediction for
    graph g of block b lives at [b, g, 0].
    """
    n_blocks = adj_blk.shape[0]
    g_pad = member_blk.shape[1]
    t_pad = weights["embed"].shape[0]

    kernel = _make_fused_kernel(n_iter, n_mlp_layer, t_pad)

    args = (ids_blk, mask_blk, adj_blk, member_blk, weights["embed"],
            weights["W"], weights["B"], weights["gamma"], weights["beta"],
            weights["RW"], weights["RB"])

    in_specs = [
        _block_spec(ids_blk.shape),
        _block_spec(mask_blk.shape),
        _block_spec(adj_blk.shape),
        _block_spec(member_blk.shape),
        _const_spec(weights["embed"].shape),
        _const_spec(weights["W"].shape),
        _const_spec(weights["B"].shape),
        _const_spec(weights["gamma"].shape),
        _const_spec(weights["beta"].shape),
        _const_spec(weights["RW"].shape),
        _const_spec(weights["RB"].shape),
    ]

    return pl.pallas_call(
        kernel,
        out_shape=jax.ShapeDtypeStruct((n_blocks, g_pad, C_PAD), jnp.float32),
        grid=(n_blocks,),
        in_specs=in_specs,
        out_specs=pl.BlockSpec((1, g_pad, C_PAD), lambda i: (i, 0, 0)),
        compiler_params=pltpu.CompilerParams(
            dimension_semantics=("parallel",),        # megacore on v7x
            vmem_limit_bytes=32 * 1024 * 1024),
    )(*args)


# ----------------------------------------------------------------------------
# Parameter construction (PyTorch-like init, lane-padded, stacked, bf16 for MXU)
# ----------------------------------------------------------------------------
def _init_linear(key, fan_in, fan_out):
    kw, kb = jax.random.split(key)
    scale = 1.0 / jnp.sqrt(jnp.asarray(fan_in, jnp.float32))
    w = jax.random.uniform(kw, (fan_in, fan_out), jnp.float32, -scale, scale)
    b = jax.random.uniform(kb, (fan_out,), jnp.float32, -scale, scale)
    return w, b


def init_params(key, net_params):
    n_iter = net_params["n_iter"]
    in_dim = net_params["in_dim"]
    hidden_dim = net_params["hidden_dim"]
    out_dim = net_params["out_dim"]
    n_mlp_layer = net_params["n_mlp_layer"]
    scale_mlp = net_params["scale_mlp"]
    num_node_types = net_params["num_node_types"]

    hidden_dim = hidden_dim + hidden_dim % 2
    out_dim = out_dim + out_dim % 2

    assert max(in_dim, hidden_dim, out_dim,
               scale_mlp * hidden_dim, scale_mlp * out_dim) <= C_PAD, \
        "channel widths must fit the 128-lane padding"

    keys = jax.random.split(key, n_iter * n_mlp_layer + 4)
    ki = iter(range(len(keys)))

    # node-type embedding table, sublane-rounded K dim, 128-lane out dim
    t_pad = _round_up(num_node_types, SUB)
    embed = jax.random.normal(keys[next(ki)], (num_node_types, in_dim),
                              jnp.float32)
    embed_pad = _pad2(embed, t_pad, C_PAD)

    layer_dims = [in_dim] + [hidden_dim] * (n_iter - 1) + [out_dim]
    Ws, Bs, gammas, betas = [], [], [], []
    for l in range(n_iter):
        mlp_dims = ([layer_dims[l]]
                    + [scale_mlp * layer_dims[l + 1]] * (n_mlp_layer - 1)
                    + [layer_dims[l + 1]])
        for m in range(n_mlp_layer):
            w, b = _init_linear(keys[next(ki)], mlp_dims[m], mlp_dims[m + 1])
            Ws.append(_pad2(w, C_PAD, C_PAD))
            Bs.append(_pad2(b.reshape(1, -1), 1, C_PAD))
        gammas.append(_pad2(jnp.ones((1, layer_dims[l + 1]), jnp.float32),
                            1, C_PAD))
        betas.append(_pad2(jnp.zeros((1, layer_dims[l + 1]), jnp.float32),
                           1, C_PAD))

    # MLPReadout: out_dim -> out_dim//2 -> out_dim//4 -> 1
    r_dims = [out_dim, out_dim // 2, out_dim // 4, 1]
    RWs, RBs = [], []
    for l in range(3):
        w, b = _init_linear(keys[next(ki)], r_dims[l], r_dims[l + 1])
        RWs.append(_pad2(w, C_PAD, C_PAD))
        RBs.append(_pad2(b.reshape(1, -1), 1, C_PAD))

    return {
        "embed": embed_pad.astype(jnp.bfloat16),          # (T_pad, 128)
        "W": jnp.stack(Ws).astype(jnp.bfloat16),          # (n_iter*n_mlp, 128, 128)
        "B": jnp.stack(Bs),                               # (n_iter*n_mlp, 1, 128) f32
        "gamma": jnp.stack(gammas),                       # (n_iter, 1, 128) f32
        "beta": jnp.stack(betas),                         # (n_iter, 1, 128) f32
        "RW": jnp.stack(RWs).astype(jnp.bfloat16),        # (3, 128, 128)
        "RB": jnp.stack(RBs),                             # (3, 1, 128) f32
    }


# ----------------------------------------------------------------------------
# Host-side block builder: one independent batched graph per block.
# ----------------------------------------------------------------------------
def build_block(key, sizes, block_n, num_node_types):
    k_adj, k_ids = jax.random.split(key)

    # graph id per node slot (-1 == padded slot)
    gid = -jnp.ones((block_n,), jnp.int32)
    member = jnp.zeros((G_PAD, block_n), jnp.float32)
    off = 0
    for gi, s in enumerate(sizes):
        gid = gid.at[off:off + s].set(gi)
        member = member.at[gi, off:off + s].set(1.0 / s)   # row-normalized
        off += s

    # random symmetric adjacency, no self loops, block-diagonal per graph,
    # zero rows/cols for padded node slots
    rand = jax.random.uniform(k_adj, (block_n, block_n))
    adj = (rand < 0.12).astype(jnp.float32)
    adj = jnp.maximum(adj, adj.T)
    adj = adj * (1.0 - jnp.eye(block_n, dtype=jnp.float32))
    same = (gid[:, None] == gid[None, :]) & (gid[:, None] >= 0)
    adj = adj * same.astype(jnp.float32)

    ids = jax.random.randint(k_ids, (block_n,), 0, num_node_types)
    mask = (gid >= 0).astype(jnp.float32).reshape(block_n, 1)
    return adj, ids.reshape(block_n, 1).astype(jnp.int32), mask, member


# ----------------------------------------------------------------------------
if __name__ == "__main__":
    key = jax.random.PRNGKey(0)
    k_param, k_blocks = jax.random.split(key)

    # Small, ZINC-flavoured configuration.
    net_params = dict(
        n_iter=3,
        in_dim=16,
        hidden_dim=32,
        out_dim=16,
        n_mlp_layer=2,
        scale_mlp=2,
        dropout=0.0,
        num_node_types=28,
    )

    weights = init_params(k_param, net_params)

    BLOCK_N = 128                                  # node slots per block (MXU M dim)
    block_sizes = [
        [40, 30, 33, 25],                          # block 0: 128 valid nodes (full)
        [50, 30, 20],                              # block 1: 100 valid + 28 padded
    ]
    keys = jax.random.split(k_blocks, len(block_sizes))
    blocks = [build_block(k, s, BLOCK_N, net_params["num_node_types"])
              for k, s in zip(keys, block_sizes)]

    adj_blk = jnp.stack([b[0] for b in blocks]).astype(jnp.bfloat16)
    ids_blk = jnp.stack([b[1] for b in blocks])
    mask_blk = jnp.stack([b[2] for b in blocks])
    member_blk = jnp.stack([b[3] for b in blocks]).astype(jnp.bfloat16)

    out = fused_forward(weights, ids_blk, mask_blk, adj_blk, member_blk,
                        n_iter=net_params["n_iter"],
                        n_mlp_layer=net_params["n_mlp_layer"])
    out = jax.block_until_ready(out)

    assert out.shape == (len(block_sizes), G_PAD, C_PAD)
    preds = jnp.concatenate(
        [out[b, :len(s), 0] for b, s in enumerate(block_sizes)])
    assert preds.shape[0] == sum(len(s) for s in block_sizes)
    assert bool(jnp.all(jnp.isfinite(preds)))
    print("KERNEL_OK")
</pallas_src>

<mosaic_0001>
module attributes {stable_mosaic.version = 11 : i64} {
  func.func @kernel(%arg0: i32, %arg1: memref<1x128x1xi32, #tpu.memory_space<vmem>>, %arg2: memref<1x128x1xf32, #tpu.memory_space<vmem>>, %arg3: memref<1x128x128xbf16, #tpu.memory_space<vmem>>, %arg4: memref<1x8x128xbf16, #tpu.memory_space<vmem>>, %arg5: memref<32x128xbf16, #tpu.memory_space<vmem>>, %arg6: memref<6x128x128xbf16, #tpu.memory_space<vmem>>, %arg7: memref<6x1x128xf32, #tpu.memory_space<vmem>>, %arg8: memref<3x1x128xf32, #tpu.memory_space<vmem>>, %arg9: memref<3x1x128xf32, #tpu.memory_space<vmem>>, %arg10: memref<3x128x128xbf16, #tpu.memory_space<vmem>>, %arg11: memref<3x1x128xf32, #tpu.memory_space<vmem>>, %arg12: memref<1x8x128xf32, #tpu.memory_space<vmem>>) attributes {dimension_semantics = [#tpu.dimension_semantics<parallel>], iteration_bounds = array<i64: 2>, scalar_prefetch = 0 : i64, scratch_operands = 0 : i64, tpu.core_type = #tpu.core_type<tc>, window_params = [{transform_indices = @transform_0, window_bounds = array<i64: 1, 128, 1>}, {transform_indices = @transform_1, window_bounds = array<i64: 1, 128, 1>}, {transform_indices = @transform_2, window_bounds = array<i64: 1, 128, 128>}, {transform_indices = @transform_3, window_bounds = array<i64: 1, 8, 128>}, {pipeline_mode = #tpu.pipeline_mode<synchronous>, transform_indices = @transform_4, window_bounds = array<i64: 32, 128>}, {pipeline_mode = #tpu.pipeline_mode<synchronous>, transform_indices = @transform_5, window_bounds = array<i64: 6, 128, 128>}, {pipeline_mode = #tpu.pipeline_mode<synchronous>, transform_indices = @transform_6, window_bounds = array<i64: 6, 1, 128>}, {pipeline_mode = #tpu.pipeline_mode<synchronous>, transform_indices = @transform_7, window_bounds = array<i64: 3, 1, 128>}, {pipeline_mode = #tpu.pipeline_mode<synchronous>, transform_indices = @transform_8, window_bounds = array<i64: 3, 1, 128>}, {pipeline_mode = #tpu.pipeline_mode<synchronous>, transform_indices = @transform_9, window_bounds = array<i64: 3, 128, 128>}, {pipeline_mode = #tpu.pipeline_mode<synchronous>, transform_indices = @transform_10, window_bounds = array<i64: 3, 1, 128>}, {transform_indices = @transform_11, window_bounds = array<i64: 1, 8, 128>}]} {
    %c0 = arith.constant 0 : index
    %c0_0 = arith.constant 0 : index
    %c0_1 = arith.constant 0 : index
    %0 = vector.load %arg1[%c0, %c0_0, %c0_1] : memref<1x128x1xi32, #tpu.memory_space<vmem>>, vector<1x128x1xi32>
    %1 = vector.shape_cast %0 : vector<1x128x1xi32> to vector<128x1xi32>
    %c0_2 = arith.constant 0 : index
    %c0_3 = arith.constant 0 : index
    %c0_4 = arith.constant 0 : index
    %2 = vector.load %arg2[%c0_2, %c0_3, %c0_4] : memref<1x128x1xf32, #tpu.memory_space<vmem>>, vector<1x128x1xf32>
    %3 = vector.shape_cast %2 : vector<1x128x1xf32> to vector<128x1xf32>
    %c0_5 = arith.constant 0 : index
    %c0_6 = arith.constant 0 : index
    %c0_7 = arith.constant 0 : index
    %4 = vector.load %arg3[%c0_5, %c0_6, %c0_7] : memref<1x128x128xbf16, #tpu.memory_space<vmem>>, vector<1x128x128xbf16>
    %5 = vector.shape_cast %4 : vector<1x128x128xbf16> to vector<128x128xbf16>
    %6 = vector.shape_cast %3 : vector<128x1xf32> to vector<1x128x1xf32>
    %cst = arith.constant dense<0.000000e+00> : vector<1xf32>
    %7 = vector.multi_reduction <add>, %6, %cst [1, 2] : vector<1x128x1xf32> to vector<1xf32>
    %8 = vector.shape_cast %7 : vector<1xf32> to vector<1x1x1xf32>
    %9 = vector.extract %8[0, 0, 0] : f32 from vector<1x1x1xf32>
    %cst_8 = arith.constant 1.000000e+00 : f32
    %10 = arith.divf %cst_8, %9 : f32
    %11 = tpu.iota {dimensions = array<i32: 1>} : vector<128x32xi32>
    %12 = vector.broadcast %1 : vector<128x1xi32> to vector<128x32xi32>
    %13 = arith.cmpi eq, %11, %12 : vector<128x32xi32>
    %14 = arith.extui %13 : vector<128x32xi1> to vector<128x32xi32>
    %15 = arith.sitofp %14 : vector<128x32xi32> to vector<128x32xf32>
    %16 = arith.truncf %15 : vector<128x32xf32> to vector<128x32xbf16>
    %c0_9 = arith.constant 0 : index
    %c0_10 = arith.constant 0 : index
    %17 = vector.load %arg5[%c0_9, %c0_10] : memref<32x128xbf16, #tpu.memory_space<vmem>>, vector<32x128xbf16>
    %cst_11 = arith.constant dense<0.000000e+00> : vector<128x128xf32>
    %18 = tpu.matmul %16, %17, %cst_11 {dimension_numbers = #tpu.dot_dimension_numbers<[1], [0], [0], [1], [0, 0, 1, 1], [], []>} : vector<128x32xbf16>, vector<32x128xbf16>, vector<128x128xf32> -> vector<128x128xf32>
    %19 = arith.truncf %18 : vector<128x128xf32> to vector<128x128xbf16>
    %cst_12 = arith.constant dense<0.000000e+00> : vector<128x128xf32>
    %20 = tpu.matmul %5, %19, %cst_12 {dimension_numbers = #tpu.dot_dimension_numbers<[1], [0], [0], [1], [0, 0, 1, 1], [], []>} : vector<128x128xbf16>, vector<128x128xbf16>, vector<128x128xf32> -> vector<128x128xf32>
    %21 = arith.addf %18, %20 : vector<128x128xf32>
    %22 = arith.truncf %21 : vector<128x128xf32> to vector<128x128xbf16>
    %c0_13 = arith.constant 0 : index
    %c0_14 = arith.constant 0 : index
    %c0_15 = arith.constant 0 : index
    %23 = vector.load %arg6[%c0_13, %c0_14, %c0_15] : memref<6x128x128xbf16, #tpu.memory_space<vmem>>, vector<1x128x128xbf16>
    %24 = vector.shape_cast %23 : vector<1x128x128xbf16> to vector<128x128xbf16>
    %cst_16 = arith.constant dense<0.000000e+00> : vector<128x128xf32>
    %25 = tpu.matmul %22, %24, %cst_16 {dimension_numbers = #tpu.dot_dimension_numbers<[1], [0], [0], [1], [0, 0, 1, 1], [], []>} : vector<128x128xbf16>, vector<128x128xbf16>, vector<128x128xf32> -> vector<128x128xf32>
    %c0_17 = arith.constant 0 : index
    %c0_18 = arith.constant 0 : index
    %c0_19 = arith.constant 0 : index
    %26 = vector.load %arg7[%c0_17, %c0_18, %c0_19] : memref<6x1x128xf32, #tpu.memory_space<vmem>>, vector<1x1x128xf32>
    %27 = vector.shape_cast %26 : vector<1x1x128xf32> to vector<1x128xf32>
    %28 = vector.broadcast %27 : vector<1x128xf32> to vector<128x128xf32>
    %29 = arith.addf %25, %28 : vector<128x128xf32>
    %cst_20 = arith.constant 0.000000e+00 : f32
    %30 = vector.broadcast %cst_20 : f32 to vector<128x128xf32>
    %31 = arith.maximumf %29, %30 : vector<128x128xf32>
    %32 = arith.truncf %31 : vector<128x128xf32> to vector<128x128xbf16>
    %c1 = arith.constant 1 : index
    %c0_21 = arith.constant 0 : index
    %c0_22 = arith.constant 0 : index
    %33 = vector.load %arg6[%c1, %c0_21, %c0_22] : memref<6x128x128xbf16, #tpu.memory_space<vmem>>, vector<1x128x128xbf16>
    %34 = vector.shape_cast %33 : vector<1x128x128xbf16> to vector<128x128xbf16>
    %cst_23 = arith.constant dense<0.000000e+00> : vector<128x128xf32>
    %35 = tpu.matmul %32, %34, %cst_23 {dimension_numbers = #tpu.dot_dimension_numbers<[1], [0], [0], [1], [0, 0, 1, 1], [], []>} : vector<128x128xbf16>, vector<128x128xbf16>, vector<128x128xf32> -> vector<128x128xf32>
    %c1_24 = arith.constant 1 : index
    %c0_25 = arith.constant 0 : index
    %c0_26 = arith.constant 0 : index
    %36 = vector.load %arg7[%c1_24, %c0_25, %c0_26] : memref<6x1x128xf32, #tpu.memory_space<vmem>>, vector<1x1x128xf32>
    %37 = vector.shape_cast %36 : vector<1x1x128xf32> to vector<1x128xf32>
    %38 = vector.broadcast %37 : vector<1x128xf32> to vector<128x128xf32>
    %39 = arith.addf %35, %38 : vector<128x128xf32>
    %40 = vector.broadcast %3 : vector<128x1xf32> to vector<128x128xf32>
    %41 = arith.mulf %39, %40 : vector<128x128xf32>
    %cst_27 = arith.constant dense<0.000000e+00> : vector<128xf32>
    %42 = vector.multi_reduction <add>, %41, %cst_27 [0] : vector<128x128xf32> to vector<128xf32>
    %43 = vector.shape_cast %42 : vector<128xf32> to vector<1x128xf32>
    %44 = arith.mulf %41, %39 : vector<128x128xf32>
    %cst_28 = arith.constant dense<0.000000e+00> : vector<128xf32>
    %45 = vector.multi_reduction <add>, %44, %cst_28 [0] : vector<128x128xf32> to vector<128xf32>
    %46 = vector.shape_cast %45 : vector<128xf32> to vector<1x128xf32>
    %47 = vector.broadcast %10 : f32 to vector<1x128xf32>
    %48 = arith.mulf %43, %47 : vector<1x128xf32>
    %49 = vector.broadcast %10 : f32 to vector<1x128xf32>
    %50 = arith.mulf %46, %49 : vector<1x128xf32>
    %51 = arith.mulf %48, %48 : vector<1x128xf32>
    %52 = arith.subf %50, %51 : vector<1x128xf32>
    %cst_29 = arith.constant 0.000000e+00 : f32
    %53 = vector.broadcast %cst_29 : f32 to vector<1x128xf32>
    %54 = arith.maximumf %52, %53 : vector<1x128xf32>
    %c0_30 = arith.constant 0 : index
    %c0_31 = arith.constant 0 : index
    %c0_32 = arith.constant 0 : index
    %55 = vector.load %arg8[%c0_30, %c0_31, %c0_32] : memref<3x1x128xf32, #tpu.memory_space<vmem>>, vector<1x1x128xf32>
    %56 = vector.shape_cast %55 : vector<1x1x128xf32> to vector<1x128xf32>
    %cst_33 = arith.constant 9.99999974E-6 : f32
    %57 = vector.broadcast %cst_33 : f32 to vector<1x128xf32>
    %58 = arith.addf %54, %57 : vector<1x128xf32>
    %59 = math.rsqrt %58 : vector<1x128xf32>
    %60 = arith.mulf %56, %59 : vector<1x128xf32>
    %c0_34 = arith.constant 0 : index
    %c0_35 = arith.constant 0 : index
    %c0_36 = arith.constant 0 : index
    %61 = vector.load %arg9[%c0_34, %c0_35, %c0_36] : memref<3x1x128xf32, #tpu.memory_space<vmem>>, vector<1x1x128xf32>
    %62 = vector.shape_cast %61 : vector<1x1x128xf32> to vector<1x128xf32>
    %63 = arith.mulf %48, %60 : vector<1x128xf32>
    %64 = arith.subf %62, %63 : vector<1x128xf32>
    %65 = vector.broadcast %60 : vector<1x128xf32> to vector<128x128xf32>
    %66 = arith.mulf %39, %65 : vector<128x128xf32>
    %67 = vector.broadcast %64 : vector<1x128xf32> to vector<128x128xf32>
    %68 = arith.addf %66, %67 : vector<128x128xf32>
    %69 = arith.truncf %68 : vector<128x128xf32> to vector<128x128xbf16>
    %cst_37 = arith.constant dense<0.000000e+00> : vector<128x128xf32>
    %70 = tpu.matmul %5, %69, %cst_37 {dimension_numbers = #tpu.dot_dimension_numbers<[1], [0], [0], [1], [0, 0, 1, 1], [], []>} : vector<128x128xbf16>, vector<128x128xbf16>, vector<128x128xf32> -> vector<128x128xf32>
    %71 = arith.addf %68, %70 : vector<128x128xf32>
    %72 = arith.truncf %71 : vector<128x128xf32> to vector<128x128xbf16>
    %c2 = arith.constant 2 : index
    %c0_38 = arith.constant 0 : index
    %c0_39 = arith.constant 0 : index
    %73 = vector.load %arg6[%c2, %c0_38, %c0_39] : memref<6x128x128xbf16, #tpu.memory_space<vmem>>, vector<1x128x128xbf16>
    %74 = vector.shape_cast %73 : vector<1x128x128xbf16> to vector<128x128xbf16>
    %cst_40 = arith.constant dense<0.000000e+00> : vector<128x128xf32>
    %75 = tpu.matmul %72, %74, %cst_40 {dimension_numbers = #tpu.dot_dimension_numbers<[1], [0], [0], [1], [0, 0, 1, 1], [], []>} : vector<128x128xbf16>, vector<128x128xbf16>, vector<128x128xf32> -> vector<128x128xf32>
    %c2_41 = arith.constant 2 : index
    %c0_42 = arith.constant 0 : index
    %c0_43 = arith.constant 0 : index
    %76 = vector.load %arg7[%c2_41, %c0_42, %c0_43] : memref<6x1x128xf32, #tpu.memory_space<vmem>>, vector<1x1x128xf32>
    %77 = vector.shape_cast %76 : vector<1x1x128xf32> to vector<1x128xf32>
    %78 = vector.broadcast %77 : vector<1x128xf32> to vector<128x128xf32>
    %79 = arith.addf %75, %78 : vector<128x128xf32>
    %cst_44 = arith.constant 0.000000e+00 : f32
    %80 = vector.broadcast %cst_44 : f32 to vector<128x128xf32>
    %81 = arith.maximumf %79, %80 : vector<128x128xf32>
    %82 = arith.truncf %81 : vector<128x128xf32> to vector<128x128xbf16>
    %c3 = arith.constant 3 : index
    %c0_45 = arith.constant 0 : index
    %c0_46 = arith.constant 0 : index
    %83 = vector.load %arg6[%c3, %c0_45, %c0_46] : memref<6x128x128xbf16, #tpu.memory_space<vmem>>, vector<1x128x128xbf16>
    %84 = vector.shape_cast %83 : vector<1x128x128xbf16> to vector<128x128xbf16>
    %cst_47 = arith.constant dense<0.000000e+00> : vector<128x128xf32>
    %85 = tpu.matmul %82, %84, %cst_47 {dimension_numbers = #tpu.dot_dimension_numbers<[1], [0], [0], [1], [0, 0, 1, 1], [], []>} : vector<128x128xbf16>, vector<128x128xbf16>, vector<128x128xf32> -> vector<128x128xf32>
    %c3_48 = arith.constant 3 : index
    %c0_49 = arith.constant 0 : index
    %c0_50 = arith.constant 0 : index
    %86 = vector.load %arg7[%c3_48, %c0_49, %c0_50] : memref<6x1x128xf32, #tpu.memory_space<vmem>>, vector<1x1x128xf32>
    %87 = vector.shape_cast %86 : vector<1x1x128xf32> to vector<1x128xf32>
    %88 = vector.broadcast %87 : vector<1x128xf32> to vector<128x128xf32>
    %89 = arith.addf %85, %88 : vector<128x128xf32>
    %90 = vector.broadcast %3 : vector<128x1xf32> to vector<128x128xf32>
    %91 = arith.mulf %89, %90 : vector<128x128xf32>
    %cst_51 = arith.constant dense<0.000000e+00> : vector<128xf32>
    %92 = vector.multi_reduction <add>, %91, %cst_51 [0] : vector<128x128xf32> to vector<128xf32>
    %93 = vector.shape_cast %92 : vector<128xf32> to vector<1x128xf32>
    %94 = arith.mulf %91, %89 : vector<128x128xf32>
    %cst_52 = arith.constant dense<0.000000e+00> : vector<128xf32>
    %95 = vector.multi_reduction <add>, %94, %cst_52 [0] : vector<128x128xf32> to vector<128xf32>
    %96 = vector.shape_cast %95 : vector<128xf32> to vector<1x128xf32>
    %97 = vector.broadcast %10 : f32 to vector<1x128xf32>
    %98 = arith.mulf %93, %97 : vector<1x128xf32>
    %99 = vector.broadcast %10 : f32 to vector<1x128xf32>
    %100 = arith.mulf %96, %99 : vector<1x128xf32>
    %101 = arith.mulf %98, %98 : vector<1x128xf32>
    %102 = arith.subf %100, %101 : vector<1x128xf32>
    %cst_53 = arith.constant 0.000000e+00 : f32
    %103 = vector.broadcast %cst_53 : f32 to vector<1x128xf32>
    %104 = arith.maximumf %102, %103 : vector<1x128xf32>
    %c1_54 = arith.constant 1 : index
    %c0_55 = arith.constant 0 : index
    %c0_56 = arith.constant 0 : index
    %105 = vector.load %arg8[%c1_54, %c0_55, %c0_56] : memref<3x1x128xf32, #tpu.memory_space<vmem>>, vector<1x1x128xf32>
    %106 = vector.shape_cast %105 : vector<1x1x128xf32> to vector<1x128xf32>
    %cst_57 = arith.constant 9.99999974E-6 : f32
    %107 = vector.broadcast %cst_57 : f32 to vector<1x128xf32>
    %108 = arith.addf %104, %107 : vector<1x128xf32>
    %109 = math.rsqrt %108 : vector<1x128xf32>
    %110 = arith.mulf %106, %109 : vector<1x128xf32>
    %c1_58 = arith.constant 1 : index
    %c0_59 = arith.constant 0 : index
    %c0_60 = arith.constant 0 : index
    %111 = vector.load %arg9[%c1_58, %c0_59, %c0_60] : memref<3x1x128xf32, #tpu.memory_space<vmem>>, vector<1x1x128xf32>
    %112 = vector.shape_cast %111 : vector<1x1x128xf32> to vector<1x128xf32>
    %113 = arith.mulf %98, %110 : vector<1x128xf32>
    %114 = arith.subf %112, %113 : vector<1x128xf32>
    %115 = vector.broadcast %110 : vector<1x128xf32> to vector<128x128xf32>
    %116 = arith.mulf %89, %115 : vector<128x128xf32>
    %117 = vector.broadcast %114 : vector<1x128xf32> to vector<128x128xf32>
    %118 = arith.addf %116, %117 : vector<128x128xf32>
    %119 = arith.truncf %118 : vector<128x128xf32> to vector<128x128xbf16>
    %cst_61 = arith.constant dense<0.000000e+00> : vector<128x128xf32>
    %120 = tpu.matmul %5, %119, %cst_61 {dimension_numbers = #tpu.dot_dimension_numbers<[1], [0], [0], [1], [0, 0, 1, 1], [], []>} : vector<128x128xbf16>, vector<128x128xbf16>, vector<128x128xf32> -> vector<128x128xf32>
    %121 = arith.addf %118, %120 : vector<128x128xf32>
    %122 = arith.truncf %121 : vector<128x128xf32> to vector<128x128xbf16>
    %c4 = arith.constant 4 : index
    %c0_62 = arith.constant 0 : index
    %c0_63 = arith.constant 0 : index
    %123 = vector.load %arg6[%c4, %c0_62, %c0_63] : memref<6x128x128xbf16, #tpu.memory_space<vmem>>, vector<1x128x128xbf16>
    %124 = vector.shape_cast %123 : vector<1x128x128xbf16> to vector<128x128xbf16>
    %cst_64 = arith.constant dense<0.000000e+00> : vector<128x128xf32>
    %125 = tpu.matmul %122, %124, %cst_64 {dimension_numbers = #tpu.dot_dimension_numbers<[1], [0], [0], [1], [0, 0, 1, 1], [], []>} : vector<128x128xbf16>, vector<128x128xbf16>, vector<128x128xf32> -> vector<128x128xf32>
    %c4_65 = arith.constant 4 : index
    %c0_66 = arith.constant 0 : index
    %c0_67 = arith.constant 0 : index
    %126 = vector.load %arg7[%c4_65, %c0_66, %c0_67] : memref<6x1x128xf32, #tpu.memory_space<vmem>>, vector<1x1x128xf32>
    %127 = vector.shape_cast %126 : vector<1x1x128xf32> to vector<1x128xf32>
    %128 = vector.broadcast %127 : vector<1x128xf32> to vector<128x128xf32>
    %129 = arith.addf %125, %128 : vector<128x128xf32>
    %cst_68 = arith.constant 0.000000e+00 : f32
    %130 = vector.broadcast %cst_68 : f32 to vector<128x128xf32>
    %131 = arith.maximumf %129, %130 : vector<128x128xf32>
    %132 = arith.truncf %131 : vector<128x128xf32> to vector<128x128xbf16>
    %c5 = arith.constant 5 : index
    %c0_69 = arith.constant 0 : index
    %c0_70 = arith.constant 0 : index
    %133 = vector.load %arg6[%c5, %c0_69, %c0_70] : memref<6x128x128xbf16, #tpu.memory_space<vmem>>, vector<1x128x128xbf16>
    %134 = vector.shape_cast %133 : vector<1x128x128xbf16> to vector<128x128xbf16>
    %cst_71 = arith.constant dense<0.000000e+00> : vector<128x128xf32>
    %135 = tpu.matmul %132, %134, %cst_71 {dimension_numbers = #tpu.dot_dimension_numbers<[1], [0], [0], [1], [0, 0, 1, 1], [], []>} : vector<128x128xbf16>, vector<128x128xbf16>, vector<128x128xf32> -> vector<128x128xf32>
    %c5_72 = arith.constant 5 : index
    %c0_73 = arith.constant 0 : index
    %c0_74 = arith.constant 0 : index
    %136 = vector.load %arg7[%c5_72, %c0_73, %c0_74] : memref<6x1x128xf32, #tpu.memory_space<vmem>>, vector<1x1x128xf32>
    %137 = vector.shape_cast %136 : vector<1x1x128xf32> to vector<1x128xf32>
    %138 = vector.broadcast %137 : vector<1x128xf32> to vector<128x128xf32>
    %139 = arith.addf %135, %138 : vector<128x128xf32>
    %140 = vector.broadcast %3 : vector<128x1xf32> to vector<128x128xf32>
    %141 = arith.mulf %139, %140 : vector<128x128xf32>
    %cst_75 = arith.constant dense<0.000000e+00> : vector<128xf32>
    %142 = vector.multi_reduction <add>, %141, %cst_75 [0] : vector<128x128xf32> to vector<128xf32>
    %143 = vector.shape_cast %142 : vector<128xf32> to vector<1x128xf32>
    %144 = arith.mulf %141, %139 : vector<128x128xf32>
    %cst_76 = arith.constant dense<0.000000e+00> : vector<128xf32>
    %145 = vector.multi_reduction <add>, %144, %cst_76 [0] : vector<128x128xf32> to vector<128xf32>
    %146 = vector.shape_cast %145 : vector<128xf32> to vector<1x128xf32>
    %147 = vector.broadcast %10 : f32 to vector<1x128xf32>
    %148 = arith.mulf %143, %147 : vector<1x128xf32>
    %149 = vector.broadcast %10 : f32 to vector<1x128xf32>
    %150 = arith.mulf %146, %149 : vector<1x128xf32>
    %151 = arith.mulf %148, %148 : vector<1x128xf32>
    %152 = arith.subf %150, %151 : vector<1x128xf32>
    %cst_77 = arith.constant 0.000000e+00 : f32
    %153 = vector.broadcast %cst_77 : f32 to vector<1x128xf32>
    %154 = arith.maximumf %152, %153 : vector<1x128xf32>
    %c2_78 = arith.constant 2 : index
    %c0_79 = arith.constant 0 : index
    %c0_80 = arith.constant 0 : index
    %155 = vector.load %arg8[%c2_78, %c0_79, %c0_80] : memref<3x1x128xf32, #tpu.memory_space<vmem>>, vector<1x1x128xf32>
    %156 = vector.shape_cast %155 : vector<1x1x128xf32> to vector<1x128xf32>
    %cst_81 = arith.constant 9.99999974E-6 : f32
    %157 = vector.broadcast %cst_81 : f32 to vector<1x128xf32>
    %158 = arith.addf %154, %157 : vector<1x128xf32>
    %159 = math.rsqrt %158 : vector<1x128xf32>
    %160 = arith.mulf %156, %159 : vector<1x128xf32>
    %c2_82 = arith.constant 2 : index
    %c0_83 = arith.constant 0 : index
    %c0_84 = arith.constant 0 : index
    %161 = vector.load %arg9[%c2_82, %c0_83, %c0_84] : memref<3x1x128xf32, #tpu.memory_space<vmem>>, vector<1x1x128xf32>
    %162 = vector.shape_cast %161 : vector<1x1x128xf32> to vector<1x128xf32>
    %163 = arith.mulf %148, %160 : vector<1x128xf32>
    %164 = arith.subf %162, %163 : vector<1x128xf32>
    %165 = vector.broadcast %160 : vector<1x128xf32> to vector<128x128xf32>
    %166 = arith.mulf %139, %165 : vector<128x128xf32>
    %167 = vector.broadcast %164 : vector<1x128xf32> to vector<128x128xf32>
    %168 = arith.addf %166, %167 : vector<128x128xf32>
    %169 = arith.truncf %168 : vector<128x128xf32> to vector<128x128xbf16>
    %c0_85 = arith.constant 0 : index
    %c0_86 = arith.constant 0 : index
    %c0_87 = arith.constant 0 : index
    %170 = vector.load %arg4[%c0_85, %c0_86, %c0_87] : memref<1x8x128xbf16, #tpu.memory_space<vmem>>, vector<1x8x128xbf16>
    %171 = vector.shape_cast %170 : vector<1x8x128xbf16> to vector<8x128xbf16>
    %cst_88 = arith.constant dense<0.000000e+00> : vector<8x128xf32>
    %172 = tpu.matmul %171, %169, %cst_88 {dimension_numbers = #tpu.dot_dimension_numbers<[1], [0], [0], [1], [0, 0, 1, 1], [], []>} : vector<8x128xbf16>, vector<128x128xbf16>, vector<8x128xf32> -> vector<8x128xf32>
    %173 = arith.truncf %172 : vector<8x128xf32> to vector<8x128xbf16>
    %c0_89 = arith.constant 0 : index
    %c0_90 = arith.constant 0 : index
    %c0_91 = arith.constant 0 : index
    %174 = vector.load %arg10[%c0_89, %c0_90, %c0_91] : memref<3x128x128xbf16, #tpu.memory_space<vmem>>, vector<1x128x128xbf16>
    %175 = vector.shape_cast %174 : vector<1x128x128xbf16> to vector<128x128xbf16>
    %cst_92 = arith.constant dense<0.000000e+00> : vector<8x128xf32>
    %176 = tpu.matmul %173, %175, %cst_92 {dimension_numbers = #tpu.dot_dimension_numbers<[1], [0], [0], [1], [0, 0, 1, 1], [], []>} : vector<8x128xbf16>, vector<128x128xbf16>, vector<8x128xf32> -> vector<8x128xf32>
    %c0_93 = arith.constant 0 : index
    %c0_94 = arith.constant 0 : index
    %c0_95 = arith.constant 0 : index
    %177 = vector.load %arg11[%c0_93, %c0_94, %c0_95] : memref<3x1x128xf32, #tpu.memory_space<vmem>>, vector<1x1x128xf32>
    %178 = vector.shape_cast %177 : vector<1x1x128xf32> to vector<1x128xf32>
    %179 = vector.broadcast %178 : vector<1x128xf32> to vector<8x128xf32>
    %180 = arith.addf %176, %179 : vector<8x128xf32>
    %cst_96 = arith.constant 0.000000e+00 : f32
    %181 = vector.broadcast %cst_96 : f32 to vector<8x128xf32>
    %182 = arith.maximumf %180, %181 : vector<8x128xf32>
    %183 = arith.truncf %182 : vector<8x128xf32> to vector<8x128xbf16>
    %c1_97 = arith.constant 1 : index
    %c0_98 = arith.constant 0 : index
    %c0_99 = arith.constant 0 : index
    %184 = vector.load %arg10[%c1_97, %c0_98, %c0_99] : memref<3x128x128xbf16, #tpu.memory_space<vmem>>, vector<1x128x128xbf16>
    %185 = vector.shape_cast %184 : vector<1x128x128xbf16> to vector<128x128xbf16>
    %cst_100 = arith.constant dense<0.000000e+00> : vector<8x128xf32>
    %186 = tpu.matmul %183, %185, %cst_100 {dimension_numbers = #tpu.dot_dimension_numbers<[1], [0], [0], [1], [0, 0, 1, 1], [], []>} : vector<8x128xbf16>, vector<128x128xbf16>, vector<8x128xf32> -> vector<8x128xf32>
    %c1_101 = arith.constant 1 : index
    %c0_102 = arith.constant 0 : index
    %c0_103 = arith.constant 0 : index
    %187 = vector.load %arg11[%c1_101, %c0_102, %c0_103] : memref<3x1x128xf32, #tpu.memory_space<vmem>>, vector<1x1x128xf32>
    %188 = vector.shape_cast %187 : vector<1x1x128xf32> to vector<1x128xf32>
    %189 = vector.broadcast %188 : vector<1x128xf32> to vector<8x128xf32>
    %190 = arith.addf %186, %189 : vector<8x128xf32>
    %cst_104 = arith.constant 0.000000e+00 : f32
    %191 = vector.broadcast %cst_104 : f32 to vector<8x128xf32>
    %192 = arith.maximumf %190, %191 : vector<8x128xf32>
    %193 = arith.truncf %192 : vector<8x128xf32> to vector<8x128xbf16>
    %c2_105 = arith.constant 2 : index
    %c0_106 = arith.constant 0 : index
    %c0_107 = arith.constant 0 : index
    %194 = vector.load %arg10[%c2_105, %c0_106, %c0_107] : memref<3x128x128xbf16, #tpu.memory_space<vmem>>, vector<1x128x128xbf16>
    %195 = vector.shape_cast %194 : vector<1x128x128xbf16> to vector<128x128xbf16>
    %cst_108 = arith.constant dense<0.000000e+00> : vector<8x128xf32>
    %196 = tpu.matmul %193, %195, %cst_108 {dimension_numbers = #tpu.dot_dimension_numbers<[1], [0], [0], [1], [0, 0, 1, 1], [], []>} : vector<8x128xbf16>, vector<128x128xbf16>, vector<8x128xf32> -> vector<8x128xf32>
    %c2_109 = arith.constant 2 : index
    %c0_110 = arith.constant 0 : index
    %c0_111 = arith.constant 0 : index
    %197 = vector.load %arg11[%c2_109, %c0_110, %c0_111] : memref<3x1x128xf32, #tpu.memory_space<vmem>>, vector<1x1x128xf32>
    %198 = vector.shape_cast %197 : vector<1x1x128xf32> to vector<1x128xf32>
    %199 = vector.broadcast %198 : vector<1x128xf32> to vector<8x128xf32>
    %200 = arith.addf %196, %199 : vector<8x128xf32>
    %c0_112 = arith.constant 0 : index
    %c0_113 = arith.constant 0 : index
    %c0_114 = arith.constant 0 : index
    %201 = vector.load %arg12[%c0_112, %c0_113, %c0_114] : memref<1x8x128xf32, #tpu.memory_space<vmem>>, vector<1x8x128xf32>
    %202 = vector.shape_cast %201 : vector<1x8x128xf32> to vector<8x128xf32>
    %203 = vector.shape_cast %200 : vector<8x128xf32> to vector<1x8x128xf32>
    tpu.vector_store %arg12[%c0_112, %c0_113, %c0_114], %203 {strides = array<i32>} : memref<1x8x128xf32, #tpu.memory_space<vmem>>, vector<1x8x128xf32>,
    return
  }
  func.func @transform_0(%arg0: i32) -> (i32, i32, i32) {
    %c0_i32 = arith.constant 0 : i32
    %c0_i32_0 = arith.constant 0 : i32
    %c0_i32_1 = arith.constant 0 : i32
    return %arg0, %c0_i32, %c0_i32_0 : i32, i32, i32
  }
  func.func @transform_1(%arg0: i32) -> (i32, i32, i32) {
    %c0_i32 = arith.constant 0 : i32
    %c0_i32_0 = arith.constant 0 : i32
    %c0_i32_1 = arith.constant 0 : i32
    return %arg0, %c0_i32, %c0_i32_0 : i32, i32, i32
  }
  func.func @transform_2(%arg0: i32) -> (i32, i32, i32) {
    %c0_i32 = arith.constant 0 : i32
    %c0_i32_0 = arith.constant 0 : i32
    %c0_i32_1 = arith.constant 0 : i32
    return %arg0, %c0_i32, %c0_i32_0 : i32, i32, i32
  }
  func.func @transform_3(%arg0: i32) -> (i32, i32, i32) {
    %c0_i32 = arith.constant 0 : i32
    %c0_i32_0 = arith.constant 0 : i32
    %c0_i32_1 = arith.constant 0 : i32
    return %arg0, %c0_i32, %c0_i32_0 : i32, i32, i32
  }
  func.func @transform_4(%arg0: i32) -> (i32, i32) {
    %c0_i32 = arith.constant 0 : i32
    %c0_i32_0 = arith.constant 0 : i32
    %c0_i32_1 = arith.constant 0 : i32
    return %c0_i32, %c0_i32_0 : i32, i32
  }
  func.func @transform_5(%arg0: i32) -> (i32, i32, i32) {
    %c0_i32 = arith.constant 0 : i32
    %c0_i32_0 = arith.constant 0 : i32
    %c0_i32_1 = arith.constant 0 : i32
    %c0_i32_2 = arith.constant 0 : i32
    return %c0_i32, %c0_i32_0, %c0_i32_1 : i32, i32, i32
  }
  func.func @transform_6(%arg0: i32) -> (i32, i32, i32) {
    %c0_i32 = arith.constant 0 : i32
    %c0_i32_0 = arith.constant 0 : i32
    %c0_i32_1 = arith.constant 0 : i32
    %c0_i32_2 = arith.constant 0 : i32
    return %c0_i32, %c0_i32_0, %c0_i32_1 : i32, i32, i32
  }
  func.func @transform_7(%arg0: i32) -> (i32, i32, i32) {
    %c0_i32 = arith.constant 0 : i32
    %c0_i32_0 = arith.constant 0 : i32
    %c0_i32_1 = arith.constant 0 : i32
    %c0_i32_2 = arith.constant 0 : i32
    return %c0_i32, %c0_i32_0, %c0_i32_1 : i32, i32, i32
  }
  func.func @transform_8(%arg0: i32) -> (i32, i32, i32) {
    %c0_i32 = arith.constant 0 : i32
    %c0_i32_0 = arith.constant 0 : i32
    %c0_i32_1 = arith.constant 0 : i32
    %c0_i32_2 = arith.constant 0 : i32
    return %c0_i32, %c0_i32_0, %c0_i32_1 : i32, i32, i32
  }
  func.func @transform_9(%arg0: i32) -> (i32, i32, i32) {
    %c0_i32 = arith.constant 0 : i32
    %c0_i32_0 = arith.constant 0 : i32
    %c0_i32_1 = arith.constant 0 : i32
    %c0_i32_2 = arith.constant 0 : i32
    return %c0_i32, %c0_i32_0, %c0_i32_1 : i32, i32, i32
  }
  func.func @transform_10(%arg0: i32) -> (i32, i32, i32) {
    %c0_i32 = arith.constant 0 : i32
    %c0_i32_0 = arith.constant 0 : i32
    %c0_i32_1 = arith.constant 0 : i32
    %c0_i32_2 = arith.constant 0 : i32
    return %c0_i32, %c0_i32_0, %c0_i32_1 : i32, i32, i32
  }
  func.func @transform_11(%arg0: i32) -> (i32, i32, i32) {
    %c0_i32 = arith.constant 0 : i32
    %c0_i32_0 = arith.constant 0 : i32
    %c0_i32_1 = arith.constant 0 : i32
    return %arg0, %c0_i32, %c0_i32_0 : i32, i32, i32
  }
}

</mosaic_0001>

<bundles_post_ra>
// kernel: fused_forward.1
= control target key start
LH: loop header
LB: loop body
LE: loop exit
PB: predicated region body
PF: predicated region fallthrough
CT: control target
= control target key end

     0   :  { %16 = vsyncpa [#allocation3], 0  ;;  %s5763_s0 = inlined_call_operand.vmem [shape: s32[2,128,1], index: 0, kind: input, shape index: {}]   ;;  %s5764_s1 = inlined_call_operand.vmem [shape: f32[2,128,1], index: 1, kind: input, shape index: {}]   ;;  %s5765_s2 = inlined_call_operand.vmem [shape: bf16[2,128,128], index: 2, kind: input, shape index: {}]   ;;  %s5766_s3 = inlined_call_operand.vmem [shape: bf16[2,8,128], index: 3, kind: input, shape index: {}]   ;;  %s5767_s4 = inlined_call_operand.hbm [shape: bf16[32,128], index: 4, kind: input, shape index: {}]   ;;  %s5768_s5 = inlined_call_operand.vmem [shape: bf16[6,128,128], index: 5, kind: input, shape index: {}]   ;;  %s5769_s6 = inlined_call_operand.hbm [shape: f32[6,1,128], index: 6, kind: input, shape index: {}]   ;;  %s5770_s7 = inlined_call_operand.vmem [shape: f32[3,1,128], index: 7, kind: input, shape index: {}]   ;;  %s5771_s8 = inlined_call_operand.hbm [shape: f32[3,1,128], index: 8, kind: input, shape index: {}]   ;;  %s5772_s9 = inlined_call_operand.hbm [shape: bf16[3,128,128], index: 9, kind: input, shape index: {}]   ;;  %s5773_s10 = inlined_call_operand.hbm [shape: f32[3,1,128], index: 10, kind: input, shape index: {}]   ;;  %s5774_s11 = inlined_call_operand.hbm [shape: f32[2,8,128], index: 11, kind: output, shape index: {}]  }
   0x1   :  { %17 = vsyncpa [#allocation6], 0 }
   0x2   :  { %18 = vsyncpa [#allocation9], 0 }
   0x3   :  { %19 = vsyncpa [#allocation4], 0 }
   0x4   :  { %21 = vsyncpa [#allocation4 + $0x1], 0  ;;  %s4685_s17 = smov 0   ;;  %s4687_s18 = smov 0  }
   0x5   :  { %s4689_s19 = smov 0   ;;  %s4691_s20 = smov 0  }
   0x6 LB: > { %5786 = sst [smem:[#allocation16_spill]] %s4606_s19  ;;  %s4706_s21 = sadd.s32 4294967295, %s4610_s20   ;;  %s4610_s20 = sphi %s4691_s20, %s5806_s20   ;;  %s4606_s19 = sphi %s4689_s19, %s5808_s19   ;;  %s4602_s18 = sphi %s4687_s18, %s5810_s18   ;;  %s4598_s17 = sphi %s4685_s17, %s5809_s17  }
   0x7   : > { %s3403_s22 = sadd.s32 4294967294, %s4610_s20   ;;  %s4710_s23 = sadd.s32 1, %s4610_s20  }
   0x8   : > { %5787 = sst [smem:[#allocation17_spill]] %s4710_s23  ;;  %s285_s24 = sadd.s32 1, %s4606_s19 }
   0x9   : > { %s282_s25 = ssub.s32 %s4610_s20, %s4710_s23  ;;  %p295_p0 = scmp.ne.s32.totalorder %s4606_s19, %s4602_s18 }
   0xa   : > { %p283_p1 = scmp.eq.s32.totalorder %s282_s25, 0  ;;  %p296_p2 = scmp.eq.s32.totalorder %s4706_s21, 1 }
   0xb   : > { %p301_p3 = scmp.ne.s32.totalorder %s4602_s18, %s4598_s17  ;;  %p302_p4 = scmp.eq.s32.totalorder %s3403_s22, 1 }
   0xc   : > { %s4721_s26 = scalar_select %p283_p1, %s4606_s19, %s285_s24  }
   0xd   : > { %p4723_p5 = por %p296_p2, %p295_p0  ;;  %p4727_p6 = por %p302_p4, %p301_p3 }
   0xe   : > { %5788 = sst [smem:[#allocation18_spill]] %s4721_s26  ;;  %p3404_p7 = scmp.ge.s32.totalorder %s4610_s20, 1 }
   0xf   : > { %s5790_s28 = scalar_select %p4727_p6, 1, 0 }
  0x10   : > { %p309_p8 = scmp.lt.s32.totalorder %s4610_s20, 3  ;;  %p5779_p9 = scmp.eq.s32.totalorder %s4706_s21, 0 }
  0x11   : > { %5791 = sst [smem:[#allocation19_spill]] %s5790_s28  ;;  %s4612_s30 = smov [#allocation5]  }
  0x12   : > { %p4734_p10 = pnand %p3404_p7, %p309_p8  ;;  %s337_s12 = sshll.u32 %s4612_s30, 4  ;;  %s338_s12 = int_to_ptr.vmem [resolvable:$true] %s337_s12 }
  0x13   : > { %s4613_s14 = smov [#allocation8]   ;;  %s4419_s22 = scalar_lea.vmem %s338_s12, 96 }
  0x14   : > { %p4233_p11 = pneg %p4734_p10  ;;  %s366_s15 = sshll.u32 %s4613_s14, 4  ;;  %s367_s15 = int_to_ptr.vmem [resolvable:$true] %s366_s15 }
  0x15   : > { %p4420_p0 = scmp.ne.s32.totalorder %s338_s12, %s4419_s22  ;;  %p4427_p3 = scmp.lt.s32.totalorder %s338_s12, %s338_s12 }
  0x16   : > { %p4742_p12 = pnand %p5779_p9, %p4233_p11  ;;  %p4428_p4 = scmp.lt.s32.totalorder %s4419_s22, %s4419_s22 }
  0x18   : > { %p4748_p13 = pneg %p4742_p12  ;;  %p4429_p7 = por %p4428_p4, %p4427_p3 }
  0x1a   : > { %p4422_p1 = pnand %p4420_p0, %p4748_p13 }
  0x1c   : > { %p4423_p2 = pneg %p4422_p1 }
  0x1e   : > { %p4430_p8 = pnand %p4429_p7, %p4423_p2 }
  0x20   : > { %4433 = shalt.err (!%p4430_p8)
}
  0x21   : > { %s5780_s24 = smov 16   ;;  %s5782_s25 = smov 1  }
  0x22   : > { %4239 = dma.hbm_to_vmem [thread:$0]  (!%p4742_p12), %s5769_s6, 96, %s338_s12, [#allocation6], %s5780_s24, %s5780_s24, %s5782_s25  }
  0x23   : > { %s4616_s26 = smov [#allocation2]   ;;  %s4445_s23 = scalar_lea.vmem %s367_s15, 3072 }
  0x24   : > { %s321_s19 = sshll.u32 %s4616_s26, 4  ;;  %p4446_p11 = scmp.ne.s32.totalorder %s367_s15, %s4445_s23  ;;  %s322_s19 = int_to_ptr.vmem [resolvable:$true] %s321_s19 }
  0x25   : > { %p4453_p2 = scmp.lt.s32.totalorder %s367_s15, %s367_s15  ;;  %p4454_p3 = scmp.lt.s32.totalorder %s4445_s23, %s4445_s23 }
  0x26   : > { %p4448_p0 = pnand %p4446_p11, %p4748_p13 }
  0x27   : > { %p4455_p4 = por %p4454_p3, %p4453_p2 }
  0x28   : > { %p4449_p1 = pneg %p4448_p0 }
  0x2a   : > { %p4456_p7 = pnand %p4455_p4, %p4449_p1 }
  0x2c   : > { %4459 = shalt.err (!%p4456_p7)
}
  0x2d   : > { %s4617_s22 = smov 64   ;;  %s4618_s28 = smov 4  }
  0x2e   : > { %4245 = dma.hbm_to_vmem [thread:$0]  (!%p4742_p12), %s5772_s9, 3072, %s367_s15, [#allocation9], %s4617_s22, %s4617_s22, %s4618_s28  }
  0x2f   : > { %s4471_s26 = scalar_lea.vmem %s322_s19, 256  ;;  %p4479_p9 = scmp.lt.s32.totalorder %s322_s19, %s322_s19 }
  0x30   : > { %p4472_p8 = scmp.ne.s32.totalorder %s322_s19, %s4471_s26  ;;  %p4480_p6 = scmp.lt.s32.totalorder %s4471_s26, %s4471_s26 }
  0x32   : > { %p4474_p11 = pnand %p4472_p8, %p4748_p13  ;;  %p4481_p2 = por %p4480_p6, %p4479_p9 }
  0x34   : > { %p4475_p0 = pneg %p4474_p11 }
  0x36   : > { %p4482_p1 = pnand %p4481_p2, %p4475_p0 }
  0x38   : > { %4485 = shalt.err (!%p4482_p1)
}
  0x39   : > { %4236 = dma.hbm_to_vmem [thread:$0]  (!%p4742_p12), %s5767_s4, 256, %s322_s19, [#allocation3], %s4617_s22, %s4617_s22, %s4618_s28  }
  0x3a   : > { %s4619_s30 = smov [#allocation7]   ;;  %s4620_s12 = smov [#allocation10]  }
  0x3b   : > { %s353_s15 = sshll.u32 %s4619_s30, 4  ;;  %s379_s24 = sshll.u32 %s4620_s12, 4  ;;  %s354_s15 = int_to_ptr.vmem [resolvable:$true] %s353_s15  ;;  %s380_s24 = int_to_ptr.vmem [resolvable:$true] %s379_s24 }
  0x3c   : > { %s4497_s25 = scalar_lea.vmem %s354_s15, 48  ;;  %s4504_s26 = scalar_lea.vmem %s354_s15, 64 }
  0x3d   : > { %p4498_p3 = scmp.ne.s32.totalorder %s354_s15, %s4497_s25  ;;  %p4505_p6 = scmp.lt.s32.totalorder %s354_s15, %s354_s15 }
  0x3e   : > { %p4506_p9 = scmp.lt.s32.totalorder %s4504_s26, %s4497_s25 }
  0x3f   : > { %p4500_p4 = pnand %p4498_p3, %p4748_p13 }
  0x40   : > { %p4507_p8 = por %p4506_p9, %p4505_p6 }
  0x41   : > { %p4501_p7 = pneg %p4500_p4 }
  0x43   : > { %p4508_p11 = pnand %p4507_p8, %p4501_p7 }
  0x45   : > { %4511 = shalt.err (!%p4508_p11)
}
  0x46   : > { %s5795_s23 = smov 1   ;;  %s5796_s19 = smov 16  }
  0x47   : > { %4242 = dma.hbm_to_vmem [thread:$0]  (!%p4742_p12), %s5771_s8, 48, %s354_s15, [#allocation6], %s5796_s19, %s5796_s19, %s5795_s23  }
  0x48   : > { %s4523_s14 = scalar_lea.vmem %s380_s24, 48  ;;  %s4530_s25 = scalar_lea.vmem %s380_s24, 64 }
  0x49   : > { %p4524_p0 = scmp.ne.s32.totalorder %s380_s24, %s4523_s14  ;;  %p4531_p3 = scmp.lt.s32.totalorder %s380_s24, %s380_s24 }
  0x4a   : > { %p4532_p4 = scmp.lt.s32.totalorder %s4530_s25, %s4523_s14 }
  0x4b   : > { %p4526_p2 = pnand %p4524_p0, %p4748_p13 }
  0x4c   : > { %p4533_p7 = por %p4532_p4, %p4531_p3 }
  0x4d   : > { %p4527_p1 = pneg %p4526_p2 }
  0x4f   : > { %p4534_p6 = pnand %p4533_p7, %p4527_p1 }
  0x51   : > { %4537 = shalt.err (!%p4534_p6)
}
  0x52   : > { %4248 = dma.hbm_to_vmem [thread:$0]  (!%p4742_p12), %s5773_s10, 48, %s380_s24, [#allocation9], %s5796_s19, %s5796_s19, %s5795_s23  }
  0x53   : > { %426 = sbr.rel (%p4734_p10) target bundleno = 3461 (0xd85), region = 64  ;;  %p5797_p13 = scmp.eq.s32.totalorder (!%p4734_p10), %s4706_s21, 0 }
  0x58   : > { %4581 = dma.done.wait (%p5797_p13), [#allocation3], 256   ;;  %p5798_p9 = pmov %p5797_p13 }
  0x5a   : > { %4583 = vsyncadd (%p5798_p9), [#allocation3], 4294967040  ;;  %p5799_p8 = pmov %p5798_p9 }
  0x5c   : > { %4585 = dma.done.wait (%p5799_p8), [#allocation6], 144   ;;  %p5800_p11 = pmov %p5799_p8 }
  0x5d   : > { %p5801_p0 = pmov %p5799_p8 }
  0x5e   : > { %4587 = vsyncadd (%p5800_p11), [#allocation6], 4294967152 }
  0x5f   : > { %4589 = dma.done.wait (%p5801_p0), [#allocation9], 3120   ;;  %p5802_p12 = pmov %p5801_p0 }
  0x60   : > { %p496_p10 = scmp.lt.s32.totalorder %s4706_s21, 1  ;;  %v4621_v0 = vmov 0   ;;  %vm564_vm0 = vcmask 7168   ;;  %v4310_v40 = vld [vmem:[#allocation2 + $0x8] sm:$0xff]   ;;  %v4311_v47 = vld [vmem:[#allocation2] sm:$0xff]   ;;  %vm730_vm5 = vcmask 261120  }
  0x61   : > { %4591 = vsyncadd (%p5802_p12), [#allocation9], 4294964176  ;;  %4309 = vset.pattern.permute.xlu1 %v4621_v0  ;;  %4308 = vset.pattern.permute.xlu0 %v4621_v0  ;;  %s3623_s14 = sshll.u32 %s4706_s21, 7 }
  0x62   : > { %s4812_s29 = scalar_select %p496_p10, %s4706_s21, 1  ;;  %3819 = vmatprep.subr.bf16.mxu0 %v4310_v40 }
  0x63   : > { %3820 = vmatpush3.bf16.msra.mxu0 %v4310_v40  ;;  %s5722_s16 = scalar_lea.hbm %s5774_s11, %s3623_s14  ;;  %s4624_s21 = smov [#allocation11]  }
  0x64   : > { %s3626_s13 = sshll.u32 %s4812_s29, 7  ;;  %3821 = vmatprep.subr.bf16.mxu0 %v4311_v47  ;;  %s3628_s28 = sshll.u32 %s4812_s29, 6 }
  0x65   : > { %s4818_s15 = scalar_lea.vmem %s5763_s0, %s3626_s13  ;;  %s4827_s19 = scalar_lea.vmem %s5764_s1, %s3626_s13 }
  0x66   : > { %v518_v1 = vld [vmem:[%s4818_s15 + $0x10] sm:$0xff]  ;;  %v516_v2 = vld [vmem:[%s4818_s15] sm:$0xff]  ;;  %v519_v3 = vld [vmem:[%s4818_s15 + $0x18] sm:$0xff]  ;;  %s4964_s25 = scalar_lea.vmem %s5765_s2, %s3628_s28  ;;  %s3424_s26 = sshll.u32 %s4812_s29, 2 }
  0x67   : > { %617 = vperm.xlu1 %4309, %v518_v1   ;;  %611 = vperm.xlu0 %4308, %v516_v2   ;;  %v517_v4 = vld [vmem:[%s4818_s15 + $0x8] sm:$0xff]  ;;  %v520_v6 = vld [vmem:[%s4818_s15 + $0x20] sm:$0xff]  ;;  %v4842_v11 = vld [vmem:[%s4827_s19 + $0x10] sm:$0xff]  ;;  %v608_v2 = vlaneseq  ;;  %s514_s28 = scalar_lea.vmem %s5766_s3, %s3424_s26  ;;  %s493_s29 = sand.u32 1, %s4602_s18  }
  0x68   : > { %v521_v5 = vld [vmem:[%s4818_s15 + $0x28] sm:$0xff]  ;;  %v4832_v7 = vld [vmem:[%s4827_s19] sm:$0xff]  ;;  %v4845_v12 = vld [vmem:[%s4827_s19 + $0x18] sm:$0xff]  ;;  %v568_v15 = vsel %vm564_vm0, %v4842_v11, 0.0  ;;  %3822 = vmatpush3.bf16.msra.mxu0 %v4311_v47  ;;  %s3417_s22 = sshll.u32 %s493_s29, 3  ;;  %s3245_s24 = scalar_lea.sflag [#allocation4], %s493_s29 }
  0x69   : > { %v4835_v8 = vld [vmem:[%s4827_s19 + $0x8] sm:$0xff]  ;;  %v565_v9 = vsel %vm564_vm0, %v4832_v7, 0.0  ;;  %v4848_v13 = vld [vmem:[%s4827_s19 + $0x20] sm:$0xff]  ;;  %v570_v16 = vsel %vm564_vm0, %v4845_v12, 0.0  ;;  %v4858_v18 = vld [vmem:[%s4827_s19 + $0x30] sm:$0xff]  ;;  %s495_s30 = scalar_lea.vmem [#allocation11], %s3417_s22 }
  0x6a   : > { %v566_v10 = vsel %vm564_vm0, %v4835_v8, 0.0  ;;  %v4855_v17 = vld [vmem:[%s4827_s19 + $0x28] sm:$0xff]  ;;  %v4861_v19 = vld [vmem:[%s4827_s19 + $0x38] sm:$0xff]  ;;  %v522_v21 = vld [vmem:[%s4818_s15 + $0x30] sm:$0xff]  ;;  %v572_v22 = vsel %vm564_vm0, %v4848_v13, 0.0  ;;  %v576_v26 = vsel %vm564_vm0, %v4858_v18, 0.0 }
  0x6b   : > { %620 = vperm.xlu1 %4309, %v519_v3   ;;  %614 = vperm.xlu0 %4308, %v517_v4   ;;  %v567_v14 = vadd.f32 %v566_v10, %v565_v9  ;;  %v523_v20 = vld [vmem:[%s4818_s15 + $0x38] sm:$0xff]  ;;  %v574_v23 = vsel %vm564_vm0, %v4855_v17, 0.0  ;;  %v4870_v24 = vld [vmem:[%s4827_s19 + $0x40] sm:$0xff]  ;;  %v4873_v25 = vld [vmem:[%s4827_s19 + $0x48] sm:$0xff]  ;;  %v578_v29 = vsel %vm564_vm0, %v4861_v19, 0.0  ;;  %v4918_v3 = vand.u32 127, %v608_v2 }
  0x6c   : > { %v4878_v27 = vld [vmem:[%s4827_s19 + $0x50] sm:$0xff]  ;;  %v580_v30 = vsel %vm564_vm0, %v4870_v24, 0.0  ;;  %v582_v31 = vsel %vm564_vm0, %v4873_v25, 0.0  ;;  %v543_v32 = vld [vmem:[%s4827_s19 + $0x58] sm:$0xff]  ;;  %v544_v33 = vld [vmem:[%s4827_s19 + $0x60] sm:$0xff]  ;;  %s3258_s12 = sshll.u32 %s495_s30, 4  ;;  %s5724_s12 = int_to_ptr.vmem [resolvable:$true] %s3258_s12 }
  0x6d   : > { %v569_v28 = vadd.f32 %v568_v15, %v567_v14  ;;  %v545_v34 = vld [vmem:[%s4827_s19 + $0x68] sm:$0xff]  ;;  %v546_v35 = vld [vmem:[%s4827_s19 + $0x70] sm:$0xff]  ;;  %v547_v36 = vld [vmem:[%s4827_s19 + $0x78] sm:$0xff]  ;;  %v584_v37 = vsel %vm564_vm0, %v4878_v27, 0.0  ;;  %v586_v38 = vsel %vm564_vm0, %v543_v32, 0.0  ;;  %v588_v39 = vsel %vm564_vm0, %v544_v33, 0.0 }
  0x6e   : > { %v590_v42 = vsel %vm564_vm0, %v545_v34, 0.0  ;;  %v592_v43 = vsel %vm564_vm0, %v546_v35, 0.0  ;;  %v525_v44 = vld [vmem:[%s4818_s15 + $0x48] sm:$0xff]  ;;  %v524_v45 = vld [vmem:[%s4818_s15 + $0x40] sm:$0xff]  ;;  %v594_v46 = vsel %vm564_vm0, %v547_v36, 0.0  ;;  %v527_v49 = vld [vmem:[%s4818_s15 + $0x58] sm:$0xff] }
  0x6f   : > { %626 = vperm.xlu1 %4309, %v521_v5   ;;  %623 = vperm.xlu0 %4308, %v520_v6   ;;  %v571_v41 = vadd.f32 %v570_v16, %v569_v28  ;;  %v526_v50 = vld [vmem:[%s4818_s15 + $0x50] sm:$0xff]  ;;  %v529_v52 = vld [vmem:[%s4818_s15 + $0x68] sm:$0xff]  ;;  %v528_v53 = vld [vmem:[%s4818_s15 + $0x60] sm:$0xff]  ;;  %s4542_s26 = sshll.u32 %s4624_s21, 4  ;;  %s4543_s26 = int_to_ptr.vmem [resolvable:$false] %s4542_s26 }
  0x70   : > { %v531_v55 = vld [vmem:[%s4818_s15 + $0x78] sm:$0xff]  ;;  %v530_v56 = vld [vmem:[%s4818_s15 + $0x70] sm:$0xff]  ;;  %s4538_s15 = scalar_lea.vmem %s5724_s12, 128  ;;  %p4545_p4 = scmp.lt.s32.totalorder %s5724_s12, %s4543_s26 }
  0x71   : > { %v573_v48 = vadd.f32 %v572_v22, %v571_v41  ;;  %v4321_v47 = vld [vmem:[%s5768_s5 + $0x30] sm:$0xff]   ;;  %p4539_p2 = scmp.ne.s32.totalorder %s5724_s12, %s4538_s15 }
  0x73   : > { %632 = vperm.xlu1 %4309, %v523_v20   ;;  %629 = vperm.xlu0 %4308, %v522_v21   ;;  %v575_v51 = vadd.f32 %v574_v23, %v573_v48  ;;  %v4322_v48 = vld [vmem:[%s5768_s5 + $0x28] sm:$0xff]   ;;  %p4540_p1 = pnand %p4539_p2, %p4723_p5 }
  0x75   : > { %v577_v54 = vadd.f32 %v576_v26, %v575_v51  ;;  %p4541_p3 = pneg %p4540_p1 }
  0x77   : > { %638 = vperm.xlu1 %4309, %v525_v44   ;;  %635 = vperm.xlu0 %4308, %v524_v45   ;;  %v579_v57 = vadd.f32 %v578_v29, %v577_v54  ;;  %v4967_v45 = vld [vmem:[%s4964_s25] sm:$0xff]  }
  0x78   : > { %3855 = vmatprep.mubr.bf16.mxu1 %v4967_v45 }
  0x79   : > { %v581_v58 = vadd.f32 %v580_v30, %v579_v57 }
  0x7b   : > { %644 = vperm.xlu1 %4309, %v527_v49   ;;  %641 = vperm.xlu0 %4308, %v526_v50   ;;  %v583_v59 = vadd.f32 %v582_v31, %v581_v58  ;;  %v4323_v49 = vld [vmem:[%s5768_s5 + $0x20] sm:$0xff]   ;;  %v4324_v50 = vld [vmem:[%s5768_s5 + $0x18] sm:$0xff]  }
  0x7d   : > { %v585_v60 = vadd.f32 %v584_v37, %v583_v59 }
  0x7f   : > { %650 = vperm.xlu1 %4309, %v529_v52   ;;  %647 = vperm.xlu0 %4308, %v528_v53   ;;  %v587_v61 = vadd.f32 %v586_v38, %v585_v60 }
  0x81   : > { %v589_v62 = vadd.f32 %v588_v39, %v587_v61 }
  0x83   : > { %656 = vperm.xlu1 %4309, %v531_v55   ;;  %653 = vperm.xlu0 %4308, %v530_v56   ;;  %v591_v63 = vadd.f32 %v590_v42, %v589_v62 }
  0x85   : > { %v593_v0 = vadd.f32 %v592_v43, %v591_v63 }
  0x87   : > { %1393 = vperm.xlu1 %4309, %v4832_v7   ;;  %v595_v1 = vadd.f32 %v594_v46, %v593_v0  ;;  %v4320_v46 = vld [vmem:[%s5768_s5 + $0x38] sm:$0xff]  }
  0x88   : > { %3871 = vmatprep.subr.bf16.mxu0 %v4320_v46 }
  0x8b   : > { %1398 = vperm.xlu1 %4309, %v4835_v8   ;;  %v5784_v8 = vmov 0.0  }
  0x8f   : > { %1403 = vperm.xlu1 %4309, %v4842_v11  }
  0x93   : > { %1408 = vperm.xlu1 %4309, %v4845_v12  }
  0x97   : > { %1413 = vperm.xlu1 %4309, %v4848_v13  }
  0x9b   : > { %1418 = vperm.xlu1 %4309, %v4855_v17  }
  0x9f   : > { %1423 = vperm.xlu1 %4309, %v4858_v18  }
  0xa2   : > { %596 = vadd.xlane.f32.xlu0 %v595_v1 }
  0xa3   : > { %1428 = vperm.xlu1 %4309, %v4861_v19  }
  0xa7   : > { %1438 = vperm.xlu1 %4309, %v4873_v25  }
  0xab   : > { %1443 = vperm.xlu1 %4309, %v4878_v27  }
  0xaf   : > { %1448 = vperm.xlu1 %4309, %v543_v32  }
  0xb3   : > { %1453 = vperm.xlu1 %4309, %v544_v33  }
  0xb7   : > { %1458 = vperm.xlu1 %4309, %v545_v34  }
  0xb8   : > { %1433 = vperm.xlu0 %4308, %v4870_v24  }
  0xbb   : > { %1463 = vperm.xlu1 %4309, %v546_v35  }
  0xbc   : > { %1468 = vperm.xlu0 %4308, %v547_v36  }
  0xe2   : > { %v618_v4 = vpop.permute.xlu1 %617  ;;  %v612_v5 = vpop.permute.xlu0 %611 }
  0xe3   : > { %vm660_vm1 = vcmp.eq.s32.totalorder %v4918_v3, %v618_v4  ;;  %vm658_vm2 = vcmp.eq.s32.totalorder %v4918_v3, %v612_v5 }
  0xe4   : > { %v3427_v9 = vsel %vm660_vm1, 1.0, %v5784_v8  ;;  %v3425_v10 = vsel %vm658_vm2, 1.0, %v5784_v8  ;;  %vm4623_vm2 = vmmov 0  }
  0xe6   : > { %v621_v6 = vpop.permute.xlu1 %620  ;;  %v615_v7 = vpop.permute.xlu0 %614 }
  0xe7   : > { %vm661_vm3 = vcmp.eq.s32.totalorder %v4918_v3, %v621_v6  ;;  %vm659_vm4 = vcmp.eq.s32.totalorder %v4918_v3, %v615_v7 }
  0xe8   : > { %v3428_v11 = vsel %vm661_vm3, 1.0, %v5784_v8  ;;  %v3426_v12 = vsel %vm659_vm4, 1.0, %v5784_v8 }
  0xe9   : > { %v707_v13 = vpack.c.bf16 %v3428_v11, %v3427_v9  ;;  %v706_v14 = vpack.c.bf16 %v3426_v12, %v3425_v10 }
  0xea   : > { %v627_v15 = vpop.permute.xlu1 %626  ;;  %v624_v16 = vpop.permute.xlu0 %623 }
  0xeb   : > { %vm663_vm6 = vcmp.eq.s32.totalorder %v4918_v3, %v627_v15  ;;  %vm662_vm7 = vcmp.eq.s32.totalorder %v4918_v3, %v624_v16  ;;  %3823 = vmatprep.mubr.msk.bf16.mxu0 %vm730_vm5, %v706_v14  ;;  %v5037_v14 = vld [vmem:[%s4964_s25 + $0x10] sm:$0xff]   ;;  %v5042_v15 = vld [vmem:[%s4964_s25 + $0x18] sm:$0xff]   ;;  %v5045_v16 = vld [vmem:[%s4964_s25 + $0x20] sm:$0xff]  }
  0xec   : > { %v3430_v17 = vsel %vm663_vm6, 1.0, %v5784_v8  ;;  %v3429_v18 = vsel %vm662_vm7, 1.0, %v5784_v8  ;;  %3824 = vmatmul.mubr.msk.bf16.vlgmr.msra.gmra.mxu0 %vm730_vm5, %v707_v13  ;;  %v5034_v13 = vld [vmem:[%s4964_s25 + $0x8] sm:$0xff]  }
  0xed   : > { %v708_v19 = vpack.c.bf16 %v3430_v17, %v3429_v18  ;;  %3872 = vmatpush3.bf16.msra.mxu0 %v4320_v46  ;;  %v5050_v17 = vld [vmem:[%s4964_s25 + $0x28] sm:$0xff]   ;;  %v5053_v18 = vld [vmem:[%s4964_s25 + $0x30] sm:$0xff]  }
  0xee   : > { %v633_v20 = vpop.permute.xlu1 %632  ;;  %v630_v21 = vpop.permute.xlu0 %629  ;;  %3873 = vmatprep.subr.bf16.mxu0 %v4321_v47 }
  0xef   : > { %vm665_vm8 = vcmp.eq.s32.totalorder %v4918_v3, %v633_v20  ;;  %vm664_vm9 = vcmp.eq.s32.totalorder %v4918_v3, %v630_v21  ;;  %3827 = vmatprep.mubr.msk.bf16.mxu0 %vm730_vm5, %v708_v19  ;;  %v5058_v19 = vld [vmem:[%s4964_s25 + $0x38] sm:$0xff]   ;;  %v4325_v20 = vld [vmem:[%s5768_s5 + $0x10] sm:$0xff]   ;;  %v4326_v21 = vld [vmem:[%s5768_s5 + $0x8] sm:$0xff]  }
  0xf0   : > { %v3432_v22 = vsel %vm665_vm8, 1.0, %v5784_v8  ;;  %v3431_v23 = vsel %vm664_vm9, 1.0, %v5784_v8 }
  0xf1   : > { %v709_v24 = vpack.c.bf16 %v3432_v22, %v3431_v23  ;;  %3874 = vmatpush3.bf16.msra.mxu0 %v4321_v47  ;;  %v4327_v22 = vld [vmem:[%s5768_s5] sm:$0xff]   ;;  %v4328_v23 = vld [vmem:[%s5768_s5 + $0x78] sm:$0xff]  }
  0xf2   : > { %v639_v25 = vpop.permute.xlu1 %638  ;;  %v636_v26 = vpop.permute.xlu0 %635  ;;  %3875 = vmatprep.subr.bf16.mxu0 %v4322_v48 }
  0xf3   : > { %vm667_vm10 = vcmp.eq.s32.totalorder %v4918_v3, %v639_v25  ;;  %vm666_vm11 = vcmp.eq.s32.totalorder %v4918_v3, %v636_v26  ;;  %v4330_v25 = vld [vmem:[%s5768_s5 + $0x68] sm:$0xff]   ;;  %v4331_v26 = vld [vmem:[%s5768_s5 + $0x60] sm:$0xff]  }
  0xf4   : > { %v3434_v27 = vsel %vm667_vm10, 1.0, %v5784_v8  ;;  %v3433_v28 = vsel %vm666_vm11, 1.0, %v5784_v8  ;;  %3828 = vmatmul.mubr.msk.bf16.gmra.mxu0 %vm730_vm5, %v709_v24  ;;  %v4329_v24 = vld [vmem:[%s5768_s5 + $0x70] sm:$0xff]  }
  0xf5   : > { %v710_v29 = vpack.c.bf16 %v3434_v27, %v3433_v28  ;;  %3876 = vmatpush3.bf16.msra.mxu0 %v4322_v48  ;;  %v4332_v27 = vld [vmem:[%s5768_s5 + $0x58] sm:$0xff]  }
  0xf6   : > { %v645_v30 = vpop.permute.xlu1 %644  ;;  %v642_v31 = vpop.permute.xlu0 %641  ;;  %3877 = vmatprep.subr.bf16.mxu0 %v4323_v49 }
  0xf7   : > { %vm669_vm12 = vcmp.eq.s32.totalorder %v4918_v3, %v645_v30  ;;  %vm668_vm13 = vcmp.eq.s32.totalorder %v4918_v3, %v642_v31  ;;  %3831 = vmatprep.mubr.msk.bf16.mxu0 %vm730_vm5, %v710_v29 }
  0xf8   : > { %v3436_v32 = vsel %vm669_vm12, 1.0, %v5784_v8  ;;  %v3435_v33 = vsel %vm668_vm13, 1.0, %v5784_v8 }
  0xf9   : > { %v711_v34 = vpack.c.bf16 %v3436_v32, %v3435_v33  ;;  %3878 = vmatpush3.bf16.msra.mxu0 %v4323_v49 }
  0xfa   : > { %v651_v35 = vpop.permute.xlu1 %650  ;;  %v648_v36 = vpop.permute.xlu0 %647  ;;  %3879 = vmatprep.subr.bf16.mxu0 %v4324_v50 }
  0xfb   : > { %vm671_vm14 = vcmp.eq.s32.totalorder %v4918_v3, %v651_v35  ;;  %vm670_vm15 = vcmp.eq.s32.totalorder %v4918_v3, %v648_v36 }
  0xfc   : > { %v3438_v37 = vsel %vm671_vm14, 1.0, %v5784_v8  ;;  %v3437_v38 = vsel %vm670_vm15, 1.0, %v5784_v8  ;;  %3832 = vmatmul.mubr.msk.bf16.gmra.mxu0 %vm730_vm5, %v711_v34 }
  0xfd   : > { %v712_v39 = vpack.c.bf16 %v3438_v37, %v3437_v38  ;;  %3880 = vmatpush3.bf16.msra.mxu0 %v4324_v50 }
  0xfe   : > { %v657_v40 = vpop.permute.xlu1 %656  ;;  %v654_v41 = vpop.permute.xlu0 %653  ;;  %3881 = vmatprep.subr.bf16.mxu0 %v4325_v20 }
  0xff   : > { %vm673_vm0 = vcmp.eq.s32.totalorder %v4918_v3, %v657_v40  ;;  %vm672_vm1 = vcmp.eq.s32.totalorder %v4918_v3, %v654_v41  ;;  %3835 = vmatprep.mubr.msk.bf16.mxu0 %vm730_vm5, %v712_v39 }
 0x100   : > { %v3440_v42 = vsel %vm673_vm0, 1.0, %v5784_v8  ;;  %v3439_v43 = vsel %vm672_vm1, 1.0, %v5784_v8 }
 0x101   : > { %v713_v44 = vpack.c.bf16 %v3440_v42, %v3439_v43  ;;  %3882 = vmatpush3.bf16.msra.mxu0 %v4325_v20 }
 0x102   : > { %3883 = vmatprep.subr.bf16.mxu0 %v4326_v21 }
 0x104   : > { %3836 = vmatmul.mubr.msk.bf16.gmra.mxu0 %vm730_vm5, %v713_v44 }
 0x105   : > { %3884 = vmatpush3.bf16.msra.mxu0 %v4326_v21 }
 0x106   : > { %3885 = vmatprep.subr.bf16.mxu0 %v4327_v22 }
 0x109   : > { %3886 = vmatpush3.bf16.msra.mxu0 %v4327_v22 }
 0x1ac   : > { %v4985_v51 = vpop.f32.mrf.mxu0 }
 0x1ae   : > { %v4987_v52 = vpop.f32.mrf.mxu0 }
 0x1b0   : > { %v4989_v53 = vpop.f32.mrf.mxu0 }
 0x1b1   : > { %v853_v11 = vpack.c.bf16 %v4989_v53, %v4985_v51 }
 0x1b2   : > { %v4991_v54 = vpop.f32.mrf.mxu0 }
 0x1b3   : > { %v852_v12 = vpack.c.bf16 %v4991_v54, %v4987_v52 }
 0x1b4   : > { %v4993_v55 = vpop.f32.mrf.mxu0 }
 0x1b6   : > { %v4995_v56 = vpop.f32.mrf.mxu0 }
 0x1b8   : > { %v4997_v57 = vpop.f32.mrf.mxu0 }
 0x1b9   : > { %v855_v9 = vpack.c.bf16 %v4997_v57, %v4993_v55 }
 0x1ba   : > { %v4999_v58 = vpop.f32.mrf.mxu0 }
 0x1bb   : > { %v854_v10 = vpack.c.bf16 %v4999_v58, %v4995_v56 }
 0x1bc   : > { %v5001_v59 = vpop.f32.mrf.mxu0 }
 0x1be   : > { %v5003_v60 = vpop.f32.mrf.mxu0 }
 0x1c0   : > { %v5005_v61 = vpop.f32.mrf.mxu0 }
 0x1c1   : > { %v857_v6 = vpack.c.bf16 %v5005_v61, %v5001_v59 }
 0x1c2   : > { %v5007_v62 = vpop.f32.mrf.mxu0 }
 0x1c3   : > { %v856_v7 = vpack.c.bf16 %v5007_v62, %v5003_v60 }
 0x1c4   : > { %v5009_v63 = vpop.f32.mrf.mxu0 }
 0x1c6   : > { %v5011_v0 = vpop.f32.mrf.mxu0 }
 0x1c8   : > { %v5013_v1 = vpop.f32.mrf.mxu0 }
 0x1c9   : > { %v859_v3 = vpack.c.bf16 %v5013_v1, %v5009_v63 }
 0x1ca   : > { %v5017_v4 = vpop.f32.mrf.mxu0 }
 0x1cb   : > { %v858_v5 = vpack.c.bf16 %v5017_v4, %v5011_v0  ;;  %3839 = vmatprep.subr.bf16.mxu1 %v859_v3 }
 0x1cc   : > { %3840 = vmatpush3.bf16.msra.mxu1 %v859_v3 }
 0x1cd   : > { %3841 = vmatprep.subr.bf16.mxu1 %v858_v5 }
 0x1d0   : > { %3842 = vmatpush3.bf16.msra.mxu1 %v858_v5 }
 0x1d1   : > { %3843 = vmatprep.subr.bf16.mxu1 %v857_v6 }
 0x1d4   : > { %3844 = vmatpush3.bf16.msra.mxu1 %v857_v6 }
 0x1d5   : > { %3845 = vmatprep.subr.bf16.mxu1 %v856_v7 }
 0x1d8   : > { %3846 = vmatpush3.bf16.msra.mxu1 %v856_v7 }
 0x1d9   : > { %3847 = vmatprep.subr.bf16.mxu1 %v855_v9 }
 0x1dc   : > { %3848 = vmatpush3.bf16.msra.mxu1 %v855_v9 }
 0x1dd   : > { %3849 = vmatprep.subr.bf16.mxu1 %v854_v10 }
 0x1e0   : > { %3850 = vmatpush3.bf16.msra.mxu1 %v854_v10 }
 0x1e1   : > { %3851 = vmatprep.subr.bf16.mxu1 %v853_v11 }
 0x1e4   : > { %3852 = vmatpush3.bf16.msra.mxu1 %v853_v11 }
 0x1e5   : > { %3853 = vmatprep.subr.bf16.mxu1 %v852_v12 }
 0x1e8   : > { %3854 = vmatpush3.bf16.msra.mxu1 %v852_v12 }
 0x1e9   : > { %3903 = vmatprep.subr.bf16.mxu1 %v4328_v23 }
 0x1eb   : > { %3856 = vmatmul.mubr.bf16.vlgmr.msra.gmra.mxu1 %v5034_v13 }
 0x1ec   : > { %3859 = vmatprep.mubr.bf16.mxu1 %v5037_v14  ;;  %3904 = vmatpush3.bf16.msra.mxu1 %v4328_v23 }
 0x1ed   : > { %3905 = vmatprep.subr.bf16.mxu1 %v4329_v24 }
 0x1f0   : > { %3906 = vmatpush3.bf16.msra.mxu1 %v4329_v24 }
 0x1f1   : > { %3907 = vmatprep.subr.bf16.mxu1 %v4330_v25 }
 0x1f3   : > { %3860 = vmatmul.mubr.bf16.gmra.mxu1 %v5042_v15 }
 0x1f4   : > { %3863 = vmatprep.mubr.bf16.mxu1 %v5045_v16  ;;  %3908 = vmatpush3.bf16.msra.mxu1 %v4330_v25 }
 0x1f5   : > { %3909 = vmatprep.subr.bf16.mxu1 %v4331_v26 }
 0x1f8   : > { %3910 = vmatpush3.bf16.msra.mxu1 %v4331_v26 }
 0x1f9   : > { %3911 = vmatprep.subr.bf16.mxu1 %v4332_v27 }
 0x1fb   : > { %3864 = vmatmul.mubr.bf16.gmra.mxu1 %v5050_v17 }
 0x1fc   : > { %3867 = vmatprep.mubr.bf16.mxu1 %v5053_v18  ;;  %3912 = vmatpush3.bf16.msra.mxu1 %v4332_v27  ;;  %v3459_v27 = vld [vmem:[#allocation5] ss:$0 sm:$0xff] }
 0x203   : > { %3868 = vmatmul.mubr.bf16.gmra.mxu1 %v5058_v19 }
 0x2ab   : > { %v3857_v28 = vpop.f32.mrf.mxu1 }
 0x2ac   : > { %v1007_v35 = vadd.f32 %v3857_v28, %v4985_v51 }
 0x2ad   : > { %v942_v29 = vpop.f32.mrf.mxu1 }
 0x2ae   : > { %v1005_v33 = vadd.f32 %v942_v29, %v4987_v52 }
 0x2af   : > { %v3858_v30 = vpop.f32.mrf.mxu1 }
 0x2b0   : > { %v1008_v31 = vadd.f32 %v3858_v30, %v4989_v53 }
 0x2b1   : > { %v945_v32 = vpop.f32.mrf.mxu1 }
 0x2b2   : > { %v1006_v34 = vadd.f32 %v945_v32, %v4991_v54  ;;  %v1022_v38 = vpack.c.bf16 %v1008_v31, %v1007_v35 }
 0x2b3   : > { %v3861_v36 = vpop.f32.mrf.mxu1 }
 0x2b4   : > { %v1021_v37 = vpack.c.bf16 %v1006_v34, %v1005_v33  ;;  %v1011_v46 = vadd.f32 %v3861_v36, %v4993_v55 }
 0x2b5   : > { %v958_v39 = vpop.f32.mrf.mxu1 }
 0x2b6   : > { %3887 = vmatprep.mubr.bf16.mxu0 %v1021_v37  ;;  %v1009_v43 = vadd.f32 %v958_v39, %v4995_v56 }
 0x2b7   : > { %v3862_v40 = vpop.f32.mrf.mxu1  ;;  %3888 = vmatmul.mubr.bf16.vlgmr.msra.gmra.mxu0 %v1022_v38 }
 0x2b8   : > { %v1012_v41 = vadd.f32 %v3862_v40, %v4997_v57 }
 0x2b9   : > { %v961_v42 = vpop.f32.mrf.mxu1 }
 0x2ba   : > { %v1010_v44 = vadd.f32 %v961_v42, %v4999_v58  ;;  %v1024_v49 = vpack.c.bf16 %v1012_v41, %v1011_v46 }
 0x2bb   : > { %v3865_v47 = vpop.f32.mrf.mxu1 }
 0x2bc   : > { %v1023_v48 = vpack.c.bf16 %v1010_v44, %v1009_v43  ;;  %v1015_v56 = vadd.f32 %v3865_v47, %v5001_v59  ;;  %v4333_v59 = vld [vmem:[%s5768_s5 + $0x50] sm:$0xff]  }
 0x2bd   : > { %v974_v50 = vpop.f32.mrf.mxu1  ;;  %3913 = vmatprep.subr.bf16.mxu1 %v4333_v59 }
 0x2be   : > { %3891 = vmatprep.mubr.bf16.mxu0 %v1023_v48  ;;  %v1013_v54 = vadd.f32 %v974_v50, %v5003_v60  ;;  %3914 = vmatpush3.bf16.msra.mxu1 %v4333_v59 }
 0x2bf   : > { %v3866_v51 = vpop.f32.mrf.mxu1  ;;  %3892 = vmatmul.mubr.bf16.gmra.mxu0 %v1024_v49 }
 0x2c0   : > { %v1016_v52 = vadd.f32 %v3866_v51, %v5005_v61 }
 0x2c1   : > { %v977_v53 = vpop.f32.mrf.mxu1 }
 0x2c2   : > { %v1014_v57 = vadd.f32 %v977_v53, %v5007_v62  ;;  %v1026_v5 = vpack.c.bf16 %v1016_v52, %v1015_v56 }
 0x2c3   : > { %v3869_v3 = vpop.f32.mrf.mxu1 }
 0x2c4   : > { %v1025_v58 = vpack.c.bf16 %v1014_v57, %v1013_v54  ;;  %v1019_v60 = vadd.f32 %v3869_v3, %v5009_v63  ;;  %v4335_v63 = vld [vmem:[%s5768_s5 + $0x40] sm:$0xff]  }
 0x2c5   : > { %v990_v55 = vpop.f32.mrf.mxu1 }
 0x2c6   : > { %3895 = vmatprep.mubr.bf16.mxu0 %v1025_v58  ;;  %v1017_v10 = vadd.f32 %v990_v55, %v5011_v0  ;;  %v4334_v0 = vld [vmem:[%s5768_s5 + $0x48] sm:$0xff]  }
 0x2c7   : > { %v3870_v6 = vpop.f32.mrf.mxu1  ;;  %3896 = vmatmul.mubr.bf16.gmra.mxu0 %v1026_v5  ;;  %3915 = vmatprep.subr.bf16.mxu1 %v4334_v0 }
 0x2c8   : > { %v1020_v7 = vadd.f32 %v3870_v6, %v5013_v1  ;;  %3916 = vmatpush3.bf16.msra.mxu1 %v4334_v0  ;;  %v597_v1 = vpop.xlane.xlu0 %596 }
 0x2c9   : > { %v993_v9 = vpop.f32.mrf.mxu1  ;;  %3917 = vmatprep.subr.bf16.mxu1 %v4335_v63 }
 0x2ca   : > { %v1018_v61 = vadd.f32 %v993_v9, %v5017_v4  ;;  %v1028_v62 = vpack.c.bf16 %v1020_v7, %v1019_v60 }
 0x2cc   : > { %v1027_v11 = vpack.c.bf16 %v1018_v61, %v1017_v10  ;;  %3918 = vmatpush3.bf16.msra.mxu1 %v4335_v63 }
 0x2ce   : > { %3899 = vmatprep.mubr.bf16.mxu0 %v1027_v11 }
 0x2cf   : > { %3900 = vmatmul.mubr.bf16.gmra.mxu0 %v1028_v62 }
 0x2d0   : > { %3951 = vmatprep.mubr.bf16.mxu0 %v4967_v45  ;;  %v598_v45 = vrot.slane %v597_v1, 4 }
 0x2d2   : > { %v599_v4 = vadd.f32 %v598_v45, %v597_v1 }
 0x2d4   : > { %v600_v12 = vrot.slane %v599_v4, 2 }
 0x2d6   : > { %v601_v20 = vadd.f32 %v600_v12, %v599_v4 }
 0x2d8   : > { %v602_v21 = vrot.slane %v601_v20, 1 }
 0x2da   : > { %v603_v22 = vadd.f32 %v602_v21, %v601_v20 }
 0x2dc   : > { %4207 = vpush %v603_v22 }
 0x30d   : > { %s4208_s19 = spop %4207 }
 0x30e   : > { %v605_v23 = vstv %s4208_s19 }
 0x30f   : > { %4392 = vrcp.f32 %v605_v23 }
 0x31c   : > { %v4393_v24 = vpop.eup %4392 }
 0x31d   : > { %4209 = vpush %v4393_v24 }
 0x34e   : > { %s4210_s23 = spop %4209 }
 0x377   : > { %v3889_v25 = vpop.f32.mrf.mxu0 }
 0x378   : > { %v1143_v31 = vadd.f32 %v3889_v25, %v3459_v27 }
 0x379   : > { %v1134_v26 = vpop.f32.mrf.mxu0 }
 0x37a   : > { %v1135_v29 = vadd.f32 %v3459_v27, %v1134_v26  ;;  %v1199_v38 = vmax.f32 %v1143_v31, 0.0 }
 0x37b   : > { %v3890_v28 = vpop.f32.mrf.mxu0 }
 0x37c   : > { %v1146_v30 = vadd.f32 %v3890_v28, %v3459_v27  ;;  %v1197_v36 = vmax.f32 %v1135_v29, 0.0  ;;  %v5111_v28 = vpop.permute.xlu1 %1393 }
 0x37d   : > { %v1137_v32 = vpop.f32.mrf.mxu0 }
 0x37e   : > { %v1138_v33 = vadd.f32 %v3459_v27, %v1137_v32  ;;  %v1200_v34 = vmax.f32 %v1146_v30, 0.0 }
 0x37f   : > { %v3893_v35 = vpop.f32.mrf.mxu0 }
 0x380   : > { %v1198_v37 = vmax.f32 %v1138_v33, 0.0  ;;  %v1214_v41 = vpack.c.bf16 %v1200_v34, %v1199_v38  ;;  %v1159_v46 = vadd.f32 %v3893_v35, %v3459_v27  ;;  %v5113_v29 = vpop.permute.xlu1 %1398 }
 0x381   : > { %v1150_v39 = vpop.f32.mrf.mxu0 }
 0x382   : > { %v1213_v40 = vpack.c.bf16 %v1198_v37, %v1197_v36  ;;  %v1151_v43 = vadd.f32 %v3459_v27, %v1150_v39  ;;  %v1203_v53 = vmax.f32 %v1159_v46, 0.0  ;;  %v5127_v36 = vld [vmem:[#allocation5 + $0x1] ss:$0 sm:$0xff] }
 0x383   : > { %v3894_v42 = vpop.f32.mrf.mxu0 }
 0x384   : > { %v1162_v44 = vadd.f32 %v3894_v42, %v3459_v27  ;;  %3919 = vmatprep.mubr.bf16.mxu1 %v1213_v40  ;;  %v1201_v51 = vmax.f32 %v1151_v43, 0.0  ;;  %v5115_v30 = vpop.permute.xlu1 %1403 }
 0x385   : > { %v1153_v47 = vpop.f32.mrf.mxu0  ;;  %3920 = vmatmul.mubr.bf16.vlgmr.msra.gmra.mxu1 %v1214_v41 }
 0x386   : > { %v1154_v48 = vadd.f32 %v3459_v27, %v1153_v47  ;;  %v1204_v49 = vmax.f32 %v1162_v44, 0.0 }
 0x387   : > { %v3897_v50 = vpop.f32.mrf.mxu0 }
 0x388   : > { %v1202_v52 = vmax.f32 %v1154_v48, 0.0  ;;  %v1216_v56 = vpack.c.bf16 %v1204_v49, %v1203_v53  ;;  %v1175_v55 = vadd.f32 %v3897_v50, %v3459_v27  ;;  %v5117_v31 = vpop.permute.xlu1 %1408 }
 0x389   : > { %v1166_v54 = vpop.f32.mrf.mxu0 }
 0x38a   : > { %v1215_v57 = vpack.c.bf16 %v1202_v52, %v1201_v51  ;;  %v1167_v58 = vadd.f32 %v3459_v27, %v1166_v54  ;;  %v1207_v11 = vmax.f32 %v1175_v55, 0.0 }
 0x38b   : > { %v3898_v3 = vpop.f32.mrf.mxu0 }
 0x38c   : > { %v1178_v5 = vadd.f32 %v3898_v3, %v3459_v27  ;;  %3923 = vmatprep.mubr.bf16.mxu1 %v1215_v57  ;;  %v1205_v61 = vmax.f32 %v1167_v58, 0.0  ;;  %v5119_v32 = vpop.permute.xlu1 %1413 }
 0x38d   : > { %v1169_v6 = vpop.f32.mrf.mxu0  ;;  %3924 = vmatmul.mubr.bf16.gmra.mxu1 %v1216_v56 }
 0x38e   : > { %v1170_v7 = vadd.f32 %v3459_v27, %v1169_v6  ;;  %v1208_v9 = vmax.f32 %v1178_v5, 0.0 }
 0x38f   : > { %v3901_v10 = vpop.f32.mrf.mxu0 }
 0x390   : > { %v1206_v60 = vmax.f32 %v1170_v7, 0.0  ;;  %v1218_v0 = vpack.c.bf16 %v1208_v9, %v1207_v11  ;;  %v1191_v4 = vadd.f32 %v3901_v10, %v3459_v27  ;;  %v5121_v33 = vpop.permute.xlu1 %1418 }
 0x391   : > { %v1182_v62 = vpop.f32.mrf.mxu0 }
 0x392   : > { %v1217_v59 = vpack.c.bf16 %v1206_v60, %v1205_v61  ;;  %v1183_v1 = vadd.f32 %v3459_v27, %v1182_v62  ;;  %v1211_v24 = vmax.f32 %v1191_v4, 0.0 }
 0x393   : > { %v3902_v63 = vpop.f32.mrf.mxu0 }
 0x394   : > { %v1194_v45 = vadd.f32 %v3902_v63, %v3459_v27  ;;  %3927 = vmatprep.mubr.bf16.mxu1 %v1217_v59  ;;  %v1209_v22 = vmax.f32 %v1183_v1, 0.0 }
 0x395   : > { %v1185_v12 = vpop.f32.mrf.mxu0  ;;  %3928 = vmatmul.mubr.bf16.gmra.mxu1 %v1218_v0 }
 0x396   : > { %v1186_v20 = vadd.f32 %v3459_v27, %v1185_v12  ;;  %v1212_v21 = vmax.f32 %v1194_v45, 0.0  ;;  %v5123_v27 = vpop.permute.xlu1 %1423 }
 0x398   : > { %v1210_v23 = vmax.f32 %v1186_v20, 0.0  ;;  %v1220_v26 = vpack.c.bf16 %v1212_v21, %v1211_v24  ;;  %v4336_v21 = vld [vmem:[%s5768_s5 + $0xb8] sm:$0xff]  }
 0x399   : > { %3967 = vmatprep.subr.bf16.mxu1 %v4336_v21 }
 0x39a   : > { %v1219_v25 = vpack.c.bf16 %v1210_v23, %v1209_v22  ;;  %v5125_v34 = vpop.permute.xlu1 %1428  ;;  %v4337_v22 = vld [vmem:[%s5768_s5 + $0xb0] sm:$0xff]   ;;  %3968 = vmatpush3.bf16.msra.mxu1 %v4336_v21 }
 0x39b   : > { %3969 = vmatprep.subr.bf16.mxu1 %v4337_v22 }
 0x39c   : > { %3931 = vmatprep.mubr.bf16.mxu1 %v1219_v25 }
 0x39d   : > { %3932 = vmatmul.mubr.bf16.gmra.mxu1 %v1220_v26 }
 0x39e   : > { %v5129_v38 = vpop.permute.xlu1 %1438  ;;  %3970 = vmatpush3.bf16.msra.mxu1 %v4337_v22 }
 0x3a2   : > { %v5145_v48 = vpop.permute.xlu1 %1443 }
 0x3a6   : > { %v5165_v61 = vpop.permute.xlu1 %1448 }
 0x445   : > { %v3921_v35 = vpop.f32.mrf.mxu1 }
 0x446   : > { %v5135_v41 = vadd.f32 %v3921_v35, %v5127_v36 }
 0x447   : > { %v1328_v37 = vpop.f32.mrf.mxu1 }
 0x448   : > { %v5132_v39 = vadd.f32 %v5127_v36, %v1328_v37  ;;  %v1473_v49 = vmul.f32 %v5115_v30, %v5135_v41 }
 0x449   : > { %v3922_v40 = vpop.f32.mrf.mxu1 }
 0x44a   : > { %v5138_v42 = vadd.f32 %v3922_v40, %v5127_v36  ;;  %v1471_v44 = vmul.f32 %v5111_v28, %v5132_v39  ;;  %v1510_v5 = vmul.f32 %v1473_v49, %v5135_v41 }
 0x44b   : > { %v1331_v43 = vpop.f32.mrf.mxu1 }
 0x44c   : > { %v5143_v46 = vadd.f32 %v5127_v36, %v1331_v43  ;;  %v1474_v51 = vmul.f32 %v5117_v31, %v5138_v42  ;;  %v1508_v53 = vmul.f32 %v1471_v44, %v5132_v39  ;;  %v5193_v43 = vpop.permute.xlu1 %1453 }
 0x44d   : > { %v3925_v47 = vpop.f32.mrf.mxu1 }
 0x44e   : > { %v1472_v50 = vmul.f32 %v5113_v29, %v5143_v46  ;;  %v5159_v3 = vadd.f32 %v3925_v47, %v5127_v36  ;;  %v1511_v9 = vmul.f32 %v1474_v51, %v5138_v42 }
 0x44f   : > { %v1344_v52 = vpop.f32.mrf.mxu1 }
 0x450   : > { %v1487_v54 = vadd.f32 %v1472_v50, %v1471_v44  ;;  %v1509_v57 = vmul.f32 %v1472_v50, %v5143_v46  ;;  %v5156_v56 = vadd.f32 %v5127_v36, %v1344_v52  ;;  %v1477_v0 = vmul.f32 %v5123_v27, %v5159_v3  ;;  %v5195_v44 = vpop.permute.xlu0 %1433 }
 0x451   : > { %v3926_v58 = vpop.f32.mrf.mxu1 }
 0x452   : > { %v1488_v55 = vadd.f32 %v1487_v54, %v1473_v49  ;;  %v1524_v6 = vadd.f32 %v1509_v57, %v1508_v53  ;;  %v1475_v7 = vmul.f32 %v5119_v32, %v5156_v56  ;;  %v5168_v62 = vadd.f32 %v3926_v58, %v5127_v36  ;;  %v4338_v54 = vld [vmem:[%s5768_s5 + $0xa8] sm:$0xff]  }
 0x453   : > { %v1347_v10 = vpop.f32.mrf.mxu1  ;;  %v1514_v47 = vmul.f32 %v1477_v0, %v5159_v3  ;;  %3971 = vmatprep.subr.bf16.mxu1 %v4338_v54 }
 0x454   : > { %v1525_v60 = vadd.f32 %v1524_v6, %v1510_v5  ;;  %v1489_v11 = vadd.f32 %v1488_v55, %v1474_v51  ;;  %v5171_v59 = vadd.f32 %v5127_v36, %v1347_v10  ;;  %v1512_v45 = vmul.f32 %v1475_v7, %v5156_v56  ;;  %3972 = vmatpush3.bf16.msra.mxu1 %v4338_v54 }
 0x455   : > { %v3929_v63 = vpop.f32.mrf.mxu1  ;;  %v1478_v24 = vmul.f32 %v5125_v34, %v5168_v62 }
 0x456   : > { %v1490_v1 = vadd.f32 %v1489_v11, %v1475_v7  ;;  %v1526_v4 = vadd.f32 %v1525_v60, %v1511_v9  ;;  %v1476_v12 = vmul.f32 %v5121_v33, %v5171_v59  ;;  %v5188_v35 = vadd.f32 %v3929_v63, %v5127_v36 }
 0x457   : > { %v1360_v20 = vpop.f32.mrf.mxu1  ;;  %v1515_v57 = vmul.f32 %v1478_v24, %v5168_v62 }
 0x458   : > { %v1527_v23 = vadd.f32 %v1526_v4, %v1512_v45  ;;  %v1491_v25 = vadd.f32 %v1490_v1, %v1476_v12  ;;  %v1513_v26 = vmul.f32 %v1476_v12, %v5171_v59  ;;  %v5191_v37 = vadd.f32 %v5127_v36, %v1360_v20  ;;  %v4339_v1 = vld [vmem:[%s5768_s5 + $0xa0] sm:$0xff]   ;;  %v5220_v45 = vpop.permute.xlu1 %1458 }
 0x459   : > { %v3930_v40 = vpop.f32.mrf.mxu1  ;;  %v1481_v6 = vmul.f32 %v5145_v48, %v5188_v35  ;;  %3973 = vmatprep.subr.bf16.mxu1 %v4339_v1 }
 0x45a   : > { %v1492_v49 = vadd.f32 %v1491_v25, %v1477_v0  ;;  %v1528_v50 = vadd.f32 %v1527_v23, %v1513_v26  ;;  %v1479_v51 = vmul.f32 %v5195_v44, %v5191_v37  ;;  %v5201_v52 = vadd.f32 %v3930_v40, %v5127_v36  ;;  %3974 = vmatpush3.bf16.msra.mxu1 %v4339_v1 }
 0x45b   : > { %v1363_v53 = vpop.f32.mrf.mxu1  ;;  %v1518_v22 = vmul.f32 %v1481_v6, %v5188_v35 }
 0x45c   : > { %v1529_v58 = vadd.f32 %v1528_v50, %v1514_v47  ;;  %v1493_v5 = vadd.f32 %v1492_v49, %v1478_v24  ;;  %v5208_v55 = vadd.f32 %v5127_v36, %v1363_v53  ;;  %v1516_v10 = vmul.f32 %v1479_v51, %v5191_v37  ;;  %v4340_v49 = vld [vmem:[%s5768_s5 + $0x98] sm:$0xff]  }
 0x45d   : > { %v3933_v7 = vpop.f32.mrf.mxu1  ;;  %v1482_v0 = vmul.f32 %v5165_v61, %v5201_v52  ;;  %3975 = vmatprep.subr.bf16.mxu1 %v4340_v49 }
 0x45e   : > { %v1494_v9 = vadd.f32 %v1493_v5, %v1479_v51  ;;  %v1530_v60 = vadd.f32 %v1529_v58, %v1515_v57  ;;  %v1480_v11 = vmul.f32 %v5129_v38, %v5208_v55  ;;  %v1385_v40 = vadd.f32 %v3933_v7, %v5127_v36  ;;  %v5236_v5 = vpop.permute.xlu1 %1463  ;;  %3976 = vmatpush3.bf16.msra.mxu1 %v4340_v49 }
 0x45f   : > { %v1376_v63 = vpop.f32.mrf.mxu1  ;;  %v1519_v50 = vmul.f32 %v1482_v0, %v5201_v52  ;;  %v5244_v49 = vstv %s4210_s23  ;;  %s4544_s23 = scalar_lea.vmem %s4543_s26, 256 }
 0x460   : > { %v1531_v4 = vadd.f32 %v1530_v60, %v1516_v10  ;;  %v1495_v12 = vadd.f32 %v1494_v9, %v1480_v11  ;;  %v1517_v20 = vmul.f32 %v1480_v11, %v5208_v55  ;;  %v5224_v21 = vadd.f32 %v5127_v36, %v1376_v63  ;;  %v5241_v60 = vpop.permute.xlu0 %1468  ;;  %p4546_p7 = scmp.lt.s32.totalorder %s4544_s23, %s4538_s15 }
 0x461   : > { %v3934_v23 = vpop.f32.mrf.mxu1  ;;  %v1485_v9 = vmul.f32 %v5236_v5, %v1385_v40 }
 0x462   : > { %v1496_v24 = vadd.f32 %v1495_v12, %v1481_v6  ;;  %v1532_v25 = vadd.f32 %v1531_v4, %v1517_v20  ;;  %v1483_v26 = vmul.f32 %v5193_v43, %v5224_v21  ;;  %v1388_v57 = vadd.f32 %v3934_v23, %v5127_v36  ;;  %p4547_p6 = por %p4546_p7, %p4545_p4 }
 0x463   : > { %v1379_v47 = vpop.f32.mrf.mxu1 }
 0x464   : > { %v1533_v51 = vadd.f32 %v1532_v25, %v1518_v22  ;;  %v1497_v53 = vadd.f32 %v1496_v24, %v1482_v0  ;;  %v1380_v58 = vadd.f32 %v5127_v36, %v1379_v47  ;;  %v1520_v54 = vmul.f32 %v1483_v26, %v5224_v21  ;;  %p4548_p13 = pnand %p4547_p6, %p4541_p3 }
 0x465   : > { %v1486_v0 = vmul.f32 %v5241_v60, %v1388_v57  ;;  %v1522_v36 = vmul.f32 %v1485_v9, %v1385_v40 }
 0x466   : > { %v1498_v6 = vadd.f32 %v1497_v53, %v1483_v26  ;;  %v1534_v7 = vadd.f32 %v1533_v51, %v1519_v50  ;;  %v1484_v10 = vmul.f32 %v5220_v45, %v1380_v58 }
 0x467   : > { %v1523_v23 = vmul.f32 %v1486_v0, %v1388_v57 }
 0x468   : > { %v1535_v11 = vadd.f32 %v1534_v7, %v1520_v54  ;;  %v1499_v63 = vadd.f32 %v1498_v6, %v1484_v10  ;;  %v1521_v4 = vmul.f32 %v1484_v10, %v1380_v58 }
 0x46a   : > { %v1500_v12 = vadd.f32 %v1499_v63, %v1485_v9  ;;  %v1536_v20 = vadd.f32 %v1535_v11, %v1521_v4 }
 0x46c   : > { %v1501_v22 = vadd.f32 %v1500_v12, %v1486_v0  ;;  %v1537_v24 = vadd.f32 %v1536_v20, %v1522_v36  ;;  %v1560_v20 = vshrl.u32 %v608_v2, 7 }
 0x46e   : > { %v1502_v1 = vrot.slane %v1501_v22, 4  ;;  %v1538_v25 = vadd.f32 %v1537_v24, %v1523_v23  ;;  %v5252_v23 = vsub.s32 0, %v1560_v20 }
 0x470   : > { %v1503_v26 = vadd.f32 %v1502_v1, %v1501_v22  ;;  %v1539_v47 = vrot.slane %v1538_v25, 4  ;;  %v1555_v1 = vld [vmem:[#allocation7] sm:$0x1] }
 0x472   : > { %v1540_v50 = vadd.f32 %v1539_v47, %v1538_v25  ;;  %v1504_v51 = vrot.slane %v1503_v26, 2 }
 0x474   : > { %v1505_v53 = vadd.f32 %v1504_v51, %v1503_v26  ;;  %v1541_v8 = vrot.slane %v1540_v50, 2 }
 0x476   : > { %v1506_v54 = vrot.slane %v1505_v53, 1  ;;  %v1542_v7 = vadd.f32 %v1541_v8, %v1540_v50  ;;  %v1551_v8 = vld [vmem:[%s5770_s7] sm:$0x1] }
 0x478   : > { %v1507_v6 = vadd.f32 %v1506_v54, %v1505_v53  ;;  %v1543_v10 = vrot.slane %v1542_v7, 1 }
 0x47a   : > { %v1544_v9 = vadd.f32 %v1543_v10, %v1542_v7  ;;  %v1546_v11 = vmul.f32 %v5244_v49, %v1507_v6 }
 0x47c   : > { %v1547_v0 = vmul.f32 %v5244_v49, %v1544_v9  ;;  %v1548_v63 = vmul.f32 %v1546_v11, %v1546_v11 }
 0x47e   : > { %v1549_v4 = vsub.f32 %v1547_v0, %v1548_v63 }
 0x480   : > { %v1550_v36 = vmax.f32 %v1549_v4, 0.0 }
 0x482   : > { %v1552_v12 = vadd.f32 1e-05, %v1550_v36 }
 0x484   : > { %4394 = vrsqrt.f32 %v1552_v12 }
 0x491   : > { %v4395_v22 = vpop.eup %4394 }
 0x492   : > { %v1554_v24 = vmul.f32 %v4395_v22, %v1551_v8 }
 0x494   : > { %v1556_v25 = vmul.f32 %v1554_v24, %v1546_v11  ;;  %v1562_v26 = vrot.slane %v1554_v24, %v5252_v23 }
 0x496   : > { %v1557_v47 = vsub.f32 %v1555_v1, %v1556_v25  ;;  %v1578_v50 = vmul.f32 %v1562_v26, %v1385_v40  ;;  %v1579_v53 = vmul.f32 %v1562_v26, %v1388_v57  ;;  %v1576_v54 = vmul.f32 %v1562_v26, %v5224_v21 }
 0x497   : > { %v1577_v2 = vmul.f32 %v1562_v26, %v1380_v58  ;;  %v1574_v0 = vmul.f32 %v1562_v26, %v5188_v35  ;;  %v1575_v40 = vmul.f32 %v1562_v26, %v5201_v52  ;;  %v1572_v63 = vmul.f32 %v1562_v26, %v5191_v37 }
 0x498   : > { %v1584_v51 = vrot.slane %v1557_v47, %v5252_v23  ;;  %v1573_v4 = vmul.f32 %v1562_v26, %v5208_v55  ;;  %v1570_v12 = vmul.f32 %v1562_v26, %v5159_v3  ;;  %v1571_v20 = vmul.f32 %v1562_v26, %v5168_v62 }
 0x499   : > { %v1568_v55 = vmul.f32 %v1562_v26, %v5156_v56  ;;  %v1569_v24 = vmul.f32 %v1562_v26, %v5171_v59  ;;  %v1566_v62 = vmul.f32 %v1562_v26, %v5135_v41  ;;  %v1567_v47 = vmul.f32 %v1562_v26, %v5138_v42 }
 0x49a   : > { %v5257_v7 = vadd.f32 %v1584_v51, %v1578_v50  ;;  %v5259_v6 = vadd.f32 %v1584_v51, %v1579_v53  ;;  %v5261_v10 = vadd.f32 %v1584_v51, %v1576_v54  ;;  %v5263_v9 = vadd.f32 %v1584_v51, %v1577_v2 }
 0x49b   : > { %v5271_v57 = vadd.f32 %v1584_v51, %v1574_v0  ;;  %v5273_v58 = vadd.f32 %v1584_v51, %v1575_v40  ;;  %v5279_v35 = vadd.f32 %v1584_v51, %v1572_v63  ;;  %v5281_v52 = vadd.f32 %v1584_v51, %v1573_v4 }
 0x49c   : > { %v1609_v11 = vpack.c.bf16 %v5259_v6, %v5257_v7  ;;  %v1608_v21 = vpack.c.bf16 %v5263_v9, %v5261_v10  ;;  %v5287_v22 = vadd.f32 %v1584_v51, %v1570_v12  ;;  %v5289_v37 = vadd.f32 %v1584_v51, %v1571_v20 }
 0x49d   : > { %v1607_v36 = vpack.c.bf16 %v5273_v58, %v5271_v57  ;;  %v1606_v8 = vpack.c.bf16 %v5281_v52, %v5279_v35  ;;  %v5295_v25 = vadd.f32 %v1584_v51, %v1568_v55  ;;  %v5297_v3 = vadd.f32 %v1584_v51, %v1569_v24 }
 0x49e   : > { %3935 = vmatprep.subr.bf16.mxu0 %v1609_v11  ;;  %v1605_v1 = vpack.c.bf16 %v5289_v37, %v5287_v22  ;;  %v1588_v53 = vadd.f32 %v1584_v51, %v1566_v62  ;;  %v1589_v56 = vadd.f32 %v1584_v51, %v1567_v47  ;;  %v1564_v59 = vmul.f32 %v1562_v26, %v5132_v39  ;;  %v4341_v39 = vld [vmem:[%s5768_s5 + $0x90] sm:$0xff]  }
 0x49f   : > { %3936 = vmatpush3.bf16.msra.mxu0 %v1609_v11  ;;  %v1604_v50 = vpack.c.bf16 %v5297_v3, %v5295_v25  ;;  %v1565_v54 = vmul.f32 %v1562_v26, %v5143_v46  ;;  %3977 = vmatprep.subr.bf16.mxu1 %v4341_v39 }
 0x4a0   : > { %3937 = vmatprep.subr.bf16.mxu0 %v1608_v21  ;;  %v1603_v2 = vpack.c.bf16 %v1589_v56, %v1588_v53  ;;  %v1586_v11 = vadd.f32 %v1584_v51, %v1564_v59  ;;  %3978 = vmatpush3.bf16.msra.mxu1 %v4341_v39 }
 0x4a1   : > { %v1587_v0 = vadd.f32 %v1584_v51, %v1565_v54 }
 0x4a3   : > { %3938 = vmatpush3.bf16.msra.mxu0 %v1608_v21  ;;  %v1602_v40 = vpack.c.bf16 %v1587_v0, %v1586_v11 }
 0x4a4   : > { %3939 = vmatprep.subr.bf16.mxu0 %v1607_v36 }
 0x4a7   : > { %3940 = vmatpush3.bf16.msra.mxu0 %v1607_v36 }
 0x4a8   : > { %3941 = vmatprep.subr.bf16.mxu0 %v1606_v8 }
 0x4ab   : > { %3942 = vmatpush3.bf16.msra.mxu0 %v1606_v8 }
 0x4ac   : > { %3943 = vmatprep.subr.bf16.mxu0 %v1605_v1 }
 0x4af   : > { %3944 = vmatpush3.bf16.msra.mxu0 %v1605_v1 }
 0x4b0   : > { %3945 = vmatprep.subr.bf16.mxu0 %v1604_v50 }
 0x4b3   : > { %3946 = vmatpush3.bf16.msra.mxu0 %v1604_v50 }
 0x4b4   : > { %3947 = vmatprep.subr.bf16.mxu0 %v1603_v2 }
 0x4b7   : > { %3948 = vmatpush3.bf16.msra.mxu0 %v1603_v2 }
 0x4b8   : > { %3949 = vmatprep.subr.bf16.mxu0 %v1602_v40 }
 0x4bb   : > { %3950 = vmatpush3.bf16.msra.mxu0 %v1602_v40 }
 0x4be   : > { %3952 = vmatmul.mubr.bf16.vlgmr.msra.gmra.mxu0 %v5034_v13  ;;  %v4342_v13 = vld [vmem:[%s5768_s5 + $0x88] sm:$0xff]  }
 0x4bf   : > { %3955 = vmatprep.mubr.bf16.mxu0 %v5037_v14  ;;  %3979 = vmatprep.subr.bf16.mxu1 %v4342_v13  ;;  %v4343_v14 = vld [vmem:[%s5768_s5 + $0x80] sm:$0xff]  }
 0x4c0   : > { %3980 = vmatpush3.bf16.msra.mxu1 %v4342_v13 }
 0x4c1   : > { %3981 = vmatprep.subr.bf16.mxu1 %v4343_v14 }
 0x4c4   : > { %3982 = vmatpush3.bf16.msra.mxu1 %v4343_v14 }
 0x4c6   : > { %3956 = vmatmul.mubr.bf16.gmra.mxu0 %v5042_v15  ;;  %v4344_v15 = vld [vmem:[%s5768_s5 + $0xf8] sm:$0xff]  }
 0x4c7   : > { %3959 = vmatprep.mubr.bf16.mxu0 %v5045_v16  ;;  %v4345_v16 = vld [vmem:[%s5768_s5 + $0xf0] sm:$0xff]   ;;  %3999 = vmatprep.subr.bf16.mxu0 %v4344_v15 }
 0x4c8   : > { %4000 = vmatpush3.bf16.msra.mxu0 %v4344_v15 }
 0x4c9   : > { %4001 = vmatprep.subr.bf16.mxu0 %v4345_v16 }
 0x4cc   : > { %4002 = vmatpush3.bf16.msra.mxu0 %v4345_v16 }
 0x4ce   : > { %3960 = vmatmul.mubr.bf16.gmra.mxu0 %v5050_v17  ;;  %v4346_v17 = vld [vmem:[%s5768_s5 + $0xe8] sm:$0xff]  }
 0x4cf   : > { %3963 = vmatprep.mubr.bf16.mxu0 %v5053_v18  ;;  %4003 = vmatprep.subr.bf16.mxu0 %v4346_v17  ;;  %v4347_v18 = vld [vmem:[%s5768_s5 + $0xe0] sm:$0xff]  }
 0x4d0   : > { %4004 = vmatpush3.bf16.msra.mxu0 %v4346_v17 }
 0x4d1   : > { %4005 = vmatprep.subr.bf16.mxu0 %v4347_v18 }
 0x4d4   : > { %4006 = vmatpush3.bf16.msra.mxu0 %v4347_v18 }
 0x4d6   : > { %3964 = vmatmul.mubr.bf16.gmra.mxu0 %v5058_v19  ;;  %v4348_v19 = vld [vmem:[%s5768_s5 + $0xd8] sm:$0xff]  }
 0x4d7   : > { %4007 = vmatprep.subr.bf16.mxu0 %v4348_v19 }
 0x4d8   : > { %4008 = vmatpush3.bf16.msra.mxu0 %v4348_v19  ;;  %v4349_v19 = vld [vmem:[%s5768_s5 + $0xd0] sm:$0xff]  }
 0x4d9   : > { %4009 = vmatprep.subr.bf16.mxu0 %v4349_v19 }
 0x4dc   : > { %4010 = vmatpush3.bf16.msra.mxu0 %v4349_v19 }
 0x57e   : > { %v3953_v41 = vpop.f32.mrf.mxu0 }
 0x57f   : > { %v1709_v4 = vadd.f32 %v3953_v41, %v1588_v53  ;;  %v3509_v41 = vld [vmem:[#allocation5 + $0x2] ss:$0 sm:$0xff] }
 0x580   : > { %v1644_v42 = vpop.f32.mrf.mxu0 }
 0x581   : > { %v1707_v21 = vadd.f32 %v1644_v42, %v1586_v11 }
 0x582   : > { %v3954_v46 = vpop.f32.mrf.mxu0 }
 0x583   : > { %v1710_v26 = vadd.f32 %v3954_v46, %v1589_v56 }
 0x584   : > { %v1647_v51 = vpop.f32.mrf.mxu0 }
 0x585   : > { %v1708_v63 = vadd.f32 %v1647_v51, %v1587_v0  ;;  %v1724_v20 = vpack.c.bf16 %v1710_v26, %v1709_v4 }
 0x586   : > { %v3957_v36 = vpop.f32.mrf.mxu0 }
 0x587   : > { %v1723_v12 = vpack.c.bf16 %v1708_v63, %v1707_v21  ;;  %v1713_v50 = vadd.f32 %v3957_v36, %v5287_v22 }
 0x588   : > { %v1660_v8 = vpop.f32.mrf.mxu0 }
 0x589   : > { %3983 = vmatprep.mubr.bf16.mxu1 %v1723_v12  ;;  %v1711_v62 = vadd.f32 %v1660_v8, %v5295_v25 }
 0x58a   : > { %v3958_v55 = vpop.f32.mrf.mxu0  ;;  %3984 = vmatmul.mubr.bf16.vlgmr.msra.gmra.mxu1 %v1724_v20 }
 0x58b   : > { %v1714_v24 = vadd.f32 %v3958_v55, %v5289_v37 }
 0x58c   : > { %v1663_v1 = vpop.f32.mrf.mxu0 }
 0x58d   : > { %v1712_v47 = vadd.f32 %v1663_v1, %v5297_v3  ;;  %v1726_v54 = vpack.c.bf16 %v1714_v24, %v1713_v50 }
 0x58e   : > { %v3961_v56 = vpop.f32.mrf.mxu0 }
 0x58f   : > { %v1725_v59 = vpack.c.bf16 %v1712_v47, %v1711_v62  ;;  %v1717_v25 = vadd.f32 %v3961_v56, %v5271_v57  ;;  %v4400_v57 = vld [vmem:[%s4964_s25] sm:$0xff]  }
 0x590   : > { %v1676_v53 = vpop.f32.mrf.mxu0 }
 0x591   : > { %3987 = vmatprep.mubr.bf16.mxu1 %v1725_v59  ;;  %v1715_v40 = vadd.f32 %v1676_v53, %v5279_v35 }
 0x592   : > { %v3962_v2 = vpop.f32.mrf.mxu0  ;;  %3988 = vmatmul.mubr.bf16.gmra.mxu1 %v1726_v54 }
 0x593   : > { %v1718_v11 = vadd.f32 %v3962_v2, %v5273_v58 }
 0x594   : > { %v1679_v0 = vpop.f32.mrf.mxu0 }
 0x595   : > { %v1716_v37 = vadd.f32 %v1679_v0, %v5281_v52  ;;  %v1728_v22 = vpack.c.bf16 %v1718_v11, %v1717_v25 }
 0x596   : > { %v3965_v39 = vpop.f32.mrf.mxu0 }
 0x597   : > { %v1727_v3 = vpack.c.bf16 %v1716_v37, %v1715_v40  ;;  %v1721_v35 = vadd.f32 %v3965_v39, %v5257_v7  ;;  %v4351_v7 = vld [vmem:[%s5768_s5 + $0xc0] sm:$0xff]  }
 0x598   : > { %v1692_v13 = vpop.f32.mrf.mxu0 }
 0x599   : > { %3991 = vmatprep.mubr.bf16.mxu1 %v1727_v3  ;;  %v1719_v58 = vadd.f32 %v1692_v13, %v5261_v10 }
 0x59a   : > { %v3966_v14 = vpop.f32.mrf.mxu0  ;;  %3992 = vmatmul.mubr.bf16.gmra.mxu1 %v1728_v22 }
 0x59b   : > { %v1722_v15 = vadd.f32 %v3966_v14, %v5259_v6  ;;  %v4350_v6 = vld [vmem:[%s5768_s5 + $0xc8] sm:$0xff]  }
 0x59c   : > { %v1695_v16 = vpop.f32.mrf.mxu0  ;;  %4011 = vmatprep.subr.bf16.mxu0 %v4350_v6 }
 0x59d   : > { %v1720_v17 = vadd.f32 %v1695_v16, %v5263_v9  ;;  %v1730_v18 = vpack.c.bf16 %v1722_v15, %v1721_v35  ;;  %4012 = vmatpush3.bf16.msra.mxu0 %v4350_v6 }
 0x59e   : > { %4013 = vmatprep.subr.bf16.mxu0 %v4351_v7 }
 0x59f   : > { %v1729_v52 = vpack.c.bf16 %v1720_v17, %v1719_v58 }
 0x5a1   : > { %3995 = vmatprep.mubr.bf16.mxu1 %v1729_v52  ;;  %4014 = vmatpush3.bf16.msra.mxu0 %v4351_v7 }
 0x5a2   : > { %3996 = vmatmul.mubr.bf16.gmra.mxu1 %v1730_v18 }
 0x5a3   : > { %4047 = vmatprep.mubr.bf16.mxu1 %v4400_v57 }
 0x64a   : > { %v3985_v10 = vpop.f32.mrf.mxu1 }
 0x64b   : > { %v1847_v51 = vadd.f32 %v3985_v10, %v3509_v41 }
 0x64c   : > { %v1838_v9 = vpop.f32.mrf.mxu1 }
 0x64d   : > { %v1839_v46 = vadd.f32 %v3509_v41, %v1838_v9  ;;  %v1903_v8 = vmax.f32 %v1847_v51, 0.0 }
 0x64e   : > { %v3986_v42 = vpop.f32.mrf.mxu1 }
 0x64f   : > { %v1850_v26 = vadd.f32 %v3986_v42, %v3509_v41  ;;  %v1901_v12 = vmax.f32 %v1839_v46, 0.0 }
 0x650   : > { %v1841_v21 = vpop.f32.mrf.mxu1 }
 0x651   : > { %v1842_v63 = vadd.f32 %v3509_v41, %v1841_v21  ;;  %v1904_v4 = vmax.f32 %v1850_v26, 0.0 }
 0x652   : > { %v3989_v36 = vpop.f32.mrf.mxu1 }
 0x653   : > { %v1902_v20 = vmax.f32 %v1842_v63, 0.0  ;;  %v1918_v1 = vpack.c.bf16 %v1904_v4, %v1903_v8  ;;  %v1863_v56 = vadd.f32 %v3989_v36, %v3509_v41  ;;  %v5358_v8 = vld [vmem:[#allocation5 + $0x3] ss:$0 sm:$0xff] }
 0x654   : > { %v1854_v55 = vpop.f32.mrf.mxu1 }
 0x655   : > { %v1917_v24 = vpack.c.bf16 %v1902_v20, %v1901_v12  ;;  %v1855_v47 = vadd.f32 %v3509_v41, %v1854_v55  ;;  %v1907_v40 = vmax.f32 %v1863_v56, 0.0 }
 0x656   : > { %v3990_v62 = vpop.f32.mrf.mxu1 }
 0x657   : > { %v1866_v50 = vadd.f32 %v3990_v62, %v3509_v41  ;;  %4015 = vmatprep.mubr.bf16.mxu0 %v1917_v24  ;;  %v1905_v11 = vmax.f32 %v1855_v47, 0.0 }
 0x658   : > { %v1857_v59 = vpop.f32.mrf.mxu1  ;;  %4016 = vmatmul.mubr.bf16.vlgmr.msra.gmra.mxu0 %v1918_v1 }
 0x659   : > { %v1858_v54 = vadd.f32 %v3509_v41, %v1857_v59  ;;  %v1908_v53 = vmax.f32 %v1866_v50, 0.0 }
 0x65a   : > { %v3993_v2 = vpop.f32.mrf.mxu1 }
 0x65b   : > { %v1906_v0 = vmax.f32 %v1858_v54, 0.0  ;;  %v1920_v39 = vpack.c.bf16 %v1908_v53, %v1907_v40  ;;  %v1879_v14 = vadd.f32 %v3993_v2, %v3509_v41 }
 0x65c   : > { %v1870_v37 = vpop.f32.mrf.mxu1 }
 0x65d   : > { %v1919_v25 = vpack.c.bf16 %v1906_v0, %v1905_v11  ;;  %v1871_v22 = vadd.f32 %v3509_v41, %v1870_v37  ;;  %v1911_v18 = vmax.f32 %v1879_v14, 0.0 }
 0x65e   : > { %v3994_v3 = vpop.f32.mrf.mxu1 }
 0x65f   : > { %v1882_v13 = vadd.f32 %v3994_v3, %v3509_v41  ;;  %4019 = vmatprep.mubr.bf16.mxu0 %v1919_v25  ;;  %v1909_v35 = vmax.f32 %v1871_v22, 0.0 }
 0x660   : > { %v1873_v15 = vpop.f32.mrf.mxu1  ;;  %4020 = vmatmul.mubr.bf16.gmra.mxu0 %v1920_v39 }
 0x661   : > { %v1874_v16 = vadd.f32 %v3509_v41, %v1873_v15  ;;  %v1912_v58 = vmax.f32 %v1882_v13, 0.0 }
 0x662   : > { %v3997_v17 = vpop.f32.mrf.mxu1 }
 0x663   : > { %v1910_v52 = vmax.f32 %v1874_v16, 0.0  ;;  %v1922_v6 = vpack.c.bf16 %v1912_v58, %v1911_v18  ;;  %v1895_v42 = vadd.f32 %v3997_v17, %v3509_v41 }
 0x664   : > { %v1886_v57 = vpop.f32.mrf.mxu1 }
 0x665   : > { %v1921_v19 = vpack.c.bf16 %v1910_v52, %v1909_v35  ;;  %v1887_v10 = vadd.f32 %v3509_v41, %v1886_v57  ;;  %v1915_v4 = vmax.f32 %v1895_v42, 0.0 }
 0x666   : > { %v3998_v7 = vpop.f32.mrf.mxu1 }
 0x667   : > { %v1898_v9 = vadd.f32 %v3998_v7, %v3509_v41  ;;  %4023 = vmatprep.mubr.bf16.mxu0 %v1921_v19  ;;  %v1913_v21 = vmax.f32 %v1887_v10, 0.0 }
 0x668   : > { %v1889_v46 = vpop.f32.mrf.mxu1  ;;  %4024 = vmatmul.mubr.bf16.gmra.mxu0 %v1922_v6 }
 0x669   : > { %v1890_v26 = vadd.f32 %v3509_v41, %v1889_v46  ;;  %v1916_v51 = vmax.f32 %v1898_v9, 0.0  ;;  %v4352_v46 = vld [vmem:[%s5768_s5 + $0x138] sm:$0xff]  }
 0x66a   : > { %4063 = vmatprep.subr.bf16.mxu0 %v4352_v46 }
 0x66b   : > { %v1914_v63 = vmax.f32 %v1890_v26, 0.0  ;;  %v1924_v12 = vpack.c.bf16 %v1916_v51, %v1915_v4  ;;  %v4353_v26 = vld [vmem:[%s5768_s5 + $0x130] sm:$0xff]   ;;  %4064 = vmatpush3.bf16.msra.mxu0 %v4352_v46 }
 0x66c   : > { %4065 = vmatprep.subr.bf16.mxu0 %v4353_v26 }
 0x66d   : > { %v1923_v36 = vpack.c.bf16 %v1914_v63, %v1913_v21 }
 0x66f   : > { %4027 = vmatprep.mubr.bf16.mxu0 %v1923_v36  ;;  %4066 = vmatpush3.bf16.msra.mxu0 %v4353_v26 }
 0x670   : > { %4028 = vmatmul.mubr.bf16.gmra.mxu0 %v1924_v12 }
 0x718   : > { %v4017_v20 = vpop.f32.mrf.mxu0 }
 0x719   : > { %v5364_v62 = vadd.f32 %v4017_v20, %v5358_v8 }
 0x71a   : > { %v2032_v55 = vpop.f32.mrf.mxu0 }
 0x71b   : > { %v5361_v24 = vadd.f32 %v5358_v8, %v2032_v55  ;;  %v2097_v54 = vmul.f32 %v5364_v62, %v5115_v30 }
 0x71c   : > { %v4018_v1 = vpop.f32.mrf.mxu0 }
 0x71d   : > { %v5367_v41 = vadd.f32 %v4018_v1, %v5358_v8  ;;  %v2095_v50 = vmul.f32 %v5361_v24, %v5111_v28  ;;  %v2134_v22 = vmul.f32 %v2097_v54, %v5364_v62 }
 0x71e   : > { %v2035_v47 = vpop.f32.mrf.mxu0 }
 0x71f   : > { %v5372_v56 = vadd.f32 %v5358_v8, %v2035_v47  ;;  %v2098_v2 = vmul.f32 %v5367_v41, %v5117_v31  ;;  %v2132_v0 = vmul.f32 %v2095_v50, %v5361_v24 }
 0x720   : > { %v4021_v59 = vpop.f32.mrf.mxu0 }
 0x721   : > { %v2096_v53 = vmul.f32 %v5372_v56, %v5113_v29  ;;  %v5386_v39 = vadd.f32 %v4021_v59, %v5358_v8  ;;  %v2135_v16 = vmul.f32 %v2098_v2, %v5367_v41 }
 0x722   : > { %v2048_v11 = vpop.f32.mrf.mxu0 }
 0x723   : > { %v2111_v40 = vadd.f32 %v2096_v53, %v2095_v50  ;;  %v2133_v37 = vmul.f32 %v2096_v53, %v5372_v56  ;;  %v5383_v25 = vadd.f32 %v5358_v8, %v2048_v11  ;;  %v2101_v57 = vmul.f32 %v5386_v39, %v5123_v27  ;;  %v4354_v53 = vld [vmem:[%s5768_s5 + $0x128] sm:$0xff]  }
 0x724   : > { %v4022_v3 = vpop.f32.mrf.mxu0  ;;  %4067 = vmatprep.subr.bf16.mxu0 %v4354_v53 }
 0x725   : > { %v2112_v13 = vadd.f32 %v2111_v40, %v2097_v54  ;;  %v2148_v14 = vadd.f32 %v2133_v37, %v2132_v0  ;;  %v2099_v15 = vmul.f32 %v5383_v25, %v5119_v32  ;;  %v5393_v52 = vadd.f32 %v4022_v3, %v5358_v8  ;;  %4068 = vmatpush3.bf16.msra.mxu0 %v4354_v53 }
 0x726   : > { %v2051_v58 = vpop.f32.mrf.mxu0  ;;  %v2138_v55 = vmul.f32 %v2101_v57, %v5386_v39 }
 0x727   : > { %v2149_v17 = vadd.f32 %v2148_v14, %v2134_v22  ;;  %v2113_v35 = vadd.f32 %v2112_v13, %v2098_v2  ;;  %v5396_v18 = vadd.f32 %v5358_v8, %v2051_v58  ;;  %v2136_v7 = vmul.f32 %v2099_v15, %v5383_v25 }
 0x728   : > { %v4025_v19 = vpop.f32.mrf.mxu0  ;;  %v2102_v21 = vmul.f32 %v5393_v52, %v5125_v34 }
 0x729   : > { %v2114_v6 = vadd.f32 %v2113_v35, %v2099_v15  ;;  %v2150_v10 = vadd.f32 %v2149_v17, %v2135_v16  ;;  %v2100_v9 = vmul.f32 %v5396_v18, %v5121_v33  ;;  %v5413_v36 = vadd.f32 %v4025_v19, %v5358_v8  ;;  %v4355_v17 = vld [vmem:[%s5768_s5 + $0x120] sm:$0xff]  }
 0x72a   : > { %v2064_v42 = vpop.f32.mrf.mxu0  ;;  %v2139_v2 = vmul.f32 %v2102_v21, %v5393_v52  ;;  %4069 = vmatprep.subr.bf16.mxu0 %v4355_v17 }
 0x72b   : > { %v2151_v51 = vadd.f32 %v2150_v10, %v2136_v7  ;;  %v2115_v63 = vadd.f32 %v2114_v6, %v2100_v9  ;;  %v2137_v4 = vmul.f32 %v2100_v9, %v5396_v18  ;;  %v5416_v12 = vadd.f32 %v5358_v8, %v2064_v42  ;;  %4070 = vmatpush3.bf16.msra.mxu0 %v4355_v17 }
 0x72c   : > { %v4026_v20 = vpop.f32.mrf.mxu0  ;;  %v2105_v37 = vmul.f32 %v5413_v36, %v5145_v48 }
 0x72d   : > { %v2116_v1 = vadd.f32 %v2115_v63, %v2101_v57  ;;  %v2152_v47 = vadd.f32 %v2151_v51, %v2137_v4  ;;  %v2103_v50 = vmul.f32 %v5416_v12, %v5195_v44  ;;  %v5422_v59 = vadd.f32 %v4026_v20, %v5358_v8 }
 0x72e   : > { %v2067_v54 = vpop.f32.mrf.mxu0  ;;  %v2142_v10 = vmul.f32 %v2105_v37, %v5413_v36 }
 0x72f   : > { %v2153_v11 = vadd.f32 %v2152_v47, %v2138_v55  ;;  %v2117_v0 = vadd.f32 %v2116_v1, %v2102_v21  ;;  %v5429_v40 = vadd.f32 %v5358_v8, %v2067_v54  ;;  %v2140_v13 = vmul.f32 %v2103_v50, %v5416_v12  ;;  %v4356_v21 = vld [vmem:[%s5768_s5 + $0x118] sm:$0xff]  }
 0x730   : > { %v4029_v3 = vpop.f32.mrf.mxu0  ;;  %v2106_v16 = vmul.f32 %v5422_v59, %v5165_v61  ;;  %4071 = vmatprep.subr.bf16.mxu0 %v4356_v21 }
 0x731   : > { %v2118_v22 = vadd.f32 %v2117_v0, %v2103_v50  ;;  %v2154_v14 = vadd.f32 %v2153_v11, %v2139_v2  ;;  %v2104_v15 = vmul.f32 %v5429_v40, %v5129_v38  ;;  %v2089_v26 = vadd.f32 %v4029_v3, %v5358_v8  ;;  %4072 = vmatpush3.bf16.msra.mxu0 %v4356_v21 }
 0x732   : > { %v2080_v58 = vpop.f32.mrf.mxu0  ;;  %v2143_v63 = vmul.f32 %v2106_v16, %v5422_v59 }
 0x733   : > { %v2155_v35 = vadd.f32 %v2154_v14, %v2140_v13  ;;  %v2119_v57 = vadd.f32 %v2118_v22, %v2104_v15  ;;  %v2141_v19 = vmul.f32 %v2104_v15, %v5429_v40  ;;  %v5443_v6 = vadd.f32 %v5358_v8, %v2080_v58 }
 0x734   : > { %v4030_v7 = vpop.f32.mrf.mxu0  ;;  %v2109_v53 = vmul.f32 %v2089_v26, %v5236_v5 }
 0x735   : > { %v2120_v9 = vadd.f32 %v2119_v57, %v2105_v37  ;;  %v2156_v42 = vadd.f32 %v2155_v35, %v2141_v19  ;;  %v2107_v46 = vmul.f32 %v5443_v6, %v5193_v43  ;;  %v2092_v55 = vadd.f32 %v4030_v7, %v5358_v8 }
 0x736   : > { %v2083_v51 = vpop.f32.mrf.mxu0  ;;  %v2146_v22 = vmul.f32 %v2109_v53, %v2089_v26 }
 0x737   : > { %v2157_v4 = vadd.f32 %v2156_v42, %v2142_v10  ;;  %v2121_v20 = vadd.f32 %v2120_v9, %v2106_v16  ;;  %v2084_v1 = vadd.f32 %v5358_v8, %v2083_v51  ;;  %v2144_v50 = vmul.f32 %v2107_v46, %v5443_v6 }
 0x738   : > { %v2110_v0 = vmul.f32 %v2092_v55, %v5241_v60 }
 0x739   : > { %v2122_v47 = vadd.f32 %v2121_v20, %v2107_v46  ;;  %v2158_v54 = vadd.f32 %v2157_v4, %v2143_v63  ;;  %v2108_v2 = vmul.f32 %v2084_v1, %v5220_v45 }
 0x73a   : > { %v2147_v8 = vmul.f32 %v2110_v0, %v2092_v55 }
 0x73b   : > { %v2159_v11 = vadd.f32 %v2158_v54, %v2144_v50  ;;  %v2123_v37 = vadd.f32 %v2122_v47, %v2108_v2  ;;  %v2145_v3 = vmul.f32 %v2108_v2, %v2084_v1  ;;  %v3543_v2 = vld [vmem:[%s5770_s7 + $0x1] sm:$0x1] }
 0x73d   : > { %v2124_v13 = vadd.f32 %v2123_v37, %v2109_v53  ;;  %v2160_v14 = vadd.f32 %v2159_v11, %v2145_v3  ;;  %v2180_v37 = vld [vmem:[#allocation7 + $0x1] sm:$0x1] }
 0x73f   : > { %v2125_v15 = vadd.f32 %v2124_v13, %v2110_v0  ;;  %v2161_v16 = vadd.f32 %v2160_v14, %v2146_v22 }
 0x741   : > { %v2126_v58 = vrot.slane %v2125_v15, 4  ;;  %v2162_v35 = vadd.f32 %v2161_v16, %v2147_v8 }
 0x743   : > { %v2127_v17 = vadd.f32 %v2126_v58, %v2125_v15  ;;  %v2163_v57 = vrot.slane %v2162_v35, 4 }
 0x745   : > { %v2128_v19 = vrot.slane %v2127_v17, 2  ;;  %v2164_v7 = vadd.f32 %v2163_v57, %v2162_v35 }
 0x747   : > { %v2129_v10 = vadd.f32 %v2128_v19, %v2127_v17  ;;  %v2165_v9 = vrot.slane %v2164_v7, 2 }
 0x749   : > { %v2130_v42 = vrot.slane %v2129_v10, 1  ;;  %v2166_v46 = vadd.f32 %v2165_v9, %v2164_v7 }
 0x74b   : > { %v2131_v51 = vadd.f32 %v2130_v42, %v2129_v10  ;;  %v2167_v63 = vrot.slane %v2166_v46, 1 }
 0x74d   : > { %v2168_v4 = vadd.f32 %v2167_v63, %v2166_v46  ;;  %v2169_v21 = vmul.f32 %v2131_v51, %v5244_v49 }
 0x74f   : > { %v2170_v20 = vmul.f32 %v2168_v4, %v5244_v49  ;;  %v2171_v47 = vmul.f32 %v2169_v21, %v2169_v21 }
 0x751   : > { %v2172_v50 = vsub.f32 %v2170_v20, %v2171_v47 }
 0x753   : > { %v2173_v54 = vmax.f32 %v2172_v50, 0.0 }
 0x755   : > { %v2176_v53 = vadd.f32 1e-05, %v2173_v54 }
 0x757   : > { %4396 = vrsqrt.f32 %v2176_v53 }
 0x764   : > { %v4397_v11 = vpop.eup %4396 }
 0x765   : > { %v2178_v0 = vmul.f32 %v4397_v11, %v3543_v2 }
 0x767   : > { %v2181_v3 = vmul.f32 %v2178_v0, %v2169_v21  ;;  %v2187_v22 = vrot.slane %v2178_v0, %v5252_v23 }
 0x769   : > { %v2182_v13 = vsub.f32 %v2180_v37, %v2181_v3  ;;  %v2202_v14 = vmul.f32 %v2187_v22, %v2084_v1  ;;  %v2203_v15 = vmul.f32 %v2187_v22, %v2089_v26  ;;  %v2204_v16 = vmul.f32 %v2187_v22, %v2092_v55  ;;  %v4401_v3 = vld [vmem:[%s4964_s25 + $0x8] sm:$0xff]  }
 0x76a   : > { %v2201_v58 = vmul.f32 %v2187_v22, %v5443_v6  ;;  %v2199_v10 = vmul.f32 %v2187_v22, %v5413_v36  ;;  %v2200_v1 = vmul.f32 %v2187_v22, %v5422_v59  ;;  %v2197_v9 = vmul.f32 %v2187_v22, %v5416_v12 }
 0x76b   : > { %v2209_v8 = vrot.slane %v2182_v13, %v5252_v23  ;;  %v2198_v42 = vmul.f32 %v2187_v22, %v5429_v40  ;;  %v2195_v51 = vmul.f32 %v2187_v22, %v5386_v39  ;;  %v2196_v63 = vmul.f32 %v2187_v22, %v5393_v52  ;;  %v4402_v13 = vld [vmem:[%s4964_s25 + $0x10] sm:$0xff]  }
 0x76c   : > { %v2193_v40 = vmul.f32 %v2187_v22, %v5383_v25  ;;  %v2194_v20 = vmul.f32 %v2187_v22, %v5396_v18  ;;  %v2191_v52 = vmul.f32 %v2187_v22, %v5364_v62  ;;  %v2192_v54 = vmul.f32 %v2187_v22, %v5367_v41 }
 0x76d   : > { %v5467_v35 = vadd.f32 %v2209_v8, %v2203_v15  ;;  %v5469_v17 = vadd.f32 %v2209_v8, %v2204_v16  ;;  %v5471_v57 = vadd.f32 %v2209_v8, %v2201_v58  ;;  %v5473_v19 = vadd.f32 %v2209_v8, %v2202_v14  ;;  %v4406_v14 = vld [vmem:[%s4964_s25 + $0x30] sm:$0xff]   ;;  %v4358_v16 = vld [vmem:[%s5768_s5 + $0x108] sm:$0xff]   ;;  %v4359_v58 = vld [vmem:[%s5768_s5 + $0x100] sm:$0xff]  }
 0x76e   : > { %v5481_v6 = vadd.f32 %v2209_v8, %v2199_v10  ;;  %v5483_v55 = vadd.f32 %v2209_v8, %v2200_v1  ;;  %v5489_v36 = vadd.f32 %v2209_v8, %v2197_v9  ;;  %v5491_v59 = vadd.f32 %v2209_v8, %v2198_v42  ;;  %v4357_v15 = vld [vmem:[%s5768_s5 + $0x110] sm:$0xff]   ;;  %v4360_v10 = vld [vmem:[%s5768_s5 + $0x178] sm:$0xff]   ;;  %v4363_v9 = vld [vmem:[%s5768_s5 + $0x160] sm:$0xff]  }
 0x76f   : > { %v2234_v7 = vpack.c.bf16 %v5469_v17, %v5467_v35  ;;  %v2233_v26 = vpack.c.bf16 %v5473_v19, %v5471_v57  ;;  %v5497_v21 = vadd.f32 %v2209_v8, %v2195_v51  ;;  %v5499_v12 = vadd.f32 %v2209_v8, %v2196_v63  ;;  %4073 = vmatprep.subr.bf16.mxu0 %v4357_v15  ;;  %v4361_v1 = vld [vmem:[%s5768_s5 + $0x170] sm:$0xff]   ;;  %v4364_v42 = vld [vmem:[%s5768_s5 + $0x158] sm:$0xff]  }
 0x770   : > { %v2232_v46 = vpack.c.bf16 %v5483_v55, %v5481_v6  ;;  %v2231_v4 = vpack.c.bf16 %v5491_v59, %v5489_v36  ;;  %v5505_v50 = vadd.f32 %v2209_v8, %v2193_v40  ;;  %v5507_v39 = vadd.f32 %v2209_v8, %v2194_v20  ;;  %4074 = vmatpush3.bf16.msra.mxu0 %v4357_v15 }
 0x771   : > { %4031 = vmatprep.subr.bf16.mxu1 %v2234_v7  ;;  %v2230_v47 = vpack.c.bf16 %v5499_v12, %v5497_v21  ;;  %v2213_v25 = vadd.f32 %v2209_v8, %v2191_v52  ;;  %v2214_v2 = vadd.f32 %v2209_v8, %v2192_v54  ;;  %v2189_v18 = vmul.f32 %v2187_v22, %v5361_v24  ;;  %v4403_v24 = vld [vmem:[%s4964_s25 + $0x18] sm:$0xff]  }
 0x772   : > { %4032 = vmatpush3.bf16.msra.mxu1 %v2234_v7  ;;  %v2229_v53 = vpack.c.bf16 %v5507_v39, %v5505_v50  ;;  %v2190_v11 = vmul.f32 %v2187_v22, %v5372_v56  ;;  %v4404_v56 = vld [vmem:[%s4964_s25 + $0x20] sm:$0xff]   ;;  %v4405_v22 = vld [vmem:[%s4964_s25 + $0x28] sm:$0xff]   ;;  %4075 = vmatprep.subr.bf16.mxu0 %v4358_v16  ;;  %v5803_v7 = vmov 0.0  }
 0x773   : > { %4033 = vmatprep.subr.bf16.mxu1 %v2233_v26  ;;  %v2228_v0 = vpack.c.bf16 %v2214_v2, %v2213_v25  ;;  %v2211_v37 = vadd.f32 %v2209_v8, %v2189_v18 }
 0x774   : > { %v2212_v62 = vadd.f32 %v2209_v8, %v2190_v11  ;;  %v4407_v8 = vld [vmem:[%s4964_s25 + $0x38] sm:$0xff]   ;;  %4076 = vmatpush3.bf16.msra.mxu0 %v4358_v16 }
 0x775   : > { %4077 = vmatprep.subr.bf16.mxu0 %v4359_v58 }
 0x776   : > { %4034 = vmatpush3.bf16.msra.mxu1 %v2233_v26  ;;  %v2227_v41 = vpack.c.bf16 %v2212_v62, %v2211_v37  ;;  %v4362_v26 = vld [vmem:[%s5768_s5 + $0x168] sm:$0xff]  }
 0x777   : > { %4035 = vmatprep.subr.bf16.mxu1 %v2232_v46 }
 0x778   : > { %4078 = vmatpush3.bf16.msra.mxu0 %v4359_v58 }
 0x779   : > { %4127 = vmatprep.subr.bf16.mxu0 %v5803_v7 }
 0x77a   : > { %4036 = vmatpush3.bf16.msra.mxu1 %v2232_v46 }
 0x77b   : > { %4037 = vmatprep.subr.bf16.mxu1 %v2231_v4 }
 0x77e   : > { %4038 = vmatpush3.bf16.msra.mxu1 %v2231_v4 }
 0x77f   : > { %4039 = vmatprep.subr.bf16.mxu1 %v2230_v47 }
 0x782   : > { %4040 = vmatpush3.bf16.msra.mxu1 %v2230_v47 }
 0x783   : > { %4041 = vmatprep.subr.bf16.mxu1 %v2229_v53 }
 0x786   : > { %4042 = vmatpush3.bf16.msra.mxu1 %v2229_v53 }
 0x787   : > { %4043 = vmatprep.subr.bf16.mxu1 %v2228_v0 }
 0x78a   : > { %4044 = vmatpush3.bf16.msra.mxu1 %v2228_v0 }
 0x78b   : > { %4045 = vmatprep.subr.bf16.mxu1 %v2227_v41 }
 0x78e   : > { %4046 = vmatpush3.bf16.msra.mxu1 %v2227_v41 }
 0x78f   : > { %4095 = vmatprep.subr.bf16.mxu1 %v4360_v10 }
 0x791   : > { %4048 = vmatmul.mubr.bf16.vlgmr.msra.gmra.mxu1 %v4401_v3 }
 0x792   : > { %4051 = vmatprep.mubr.bf16.mxu1 %v4402_v13  ;;  %4096 = vmatpush3.bf16.msra.mxu1 %v4360_v10 }
 0x793   : > { %4097 = vmatprep.subr.bf16.mxu1 %v4361_v1 }
 0x796   : > { %4098 = vmatpush3.bf16.msra.mxu1 %v4361_v1 }
 0x797   : > { %4099 = vmatprep.subr.bf16.mxu1 %v4362_v26 }
 0x799   : > { %4052 = vmatmul.mubr.bf16.gmra.mxu1 %v4403_v24 }
 0x79a   : > { %4055 = vmatprep.mubr.bf16.mxu1 %v4404_v56  ;;  %4100 = vmatpush3.bf16.msra.mxu1 %v4362_v26 }
 0x79b   : > { %4101 = vmatprep.subr.bf16.mxu1 %v4363_v9 }
 0x79e   : > { %4102 = vmatpush3.bf16.msra.mxu1 %v4363_v9 }
 0x79f   : > { %4103 = vmatprep.subr.bf16.mxu1 %v4364_v42 }
 0x7a1   : > { %4056 = vmatmul.mubr.bf16.gmra.mxu1 %v4405_v22 }
 0x7a2   : > { %4059 = vmatprep.mubr.bf16.mxu1 %v4406_v14  ;;  %4104 = vmatpush3.bf16.msra.mxu1 %v4364_v42 }
 0x7a9   : > { %4060 = vmatmul.mubr.bf16.gmra.mxu1 %v4407_v8 }
 0x851   : > { %v4049_v46 = vpop.f32.mrf.mxu1 }
 0x852   : > { %v2334_v52 = vadd.f32 %v4049_v46, %v2213_v25  ;;  %v3560_v46 = vld [vmem:[#allocation5 + $0x4] ss:$0 sm:$0xff] }
 0x853   : > { %v2269_v51 = vpop.f32.mrf.mxu1 }
 0x854   : > { %v2332_v20 = vadd.f32 %v2269_v51, %v2211_v37 }
 0x855   : > { %v4050_v63 = vpop.f32.mrf.mxu1 }
 0x856   : > { %v2335_v4 = vadd.f32 %v4050_v63, %v2214_v2 }
 0x857   : > { %v2272_v40 = vpop.f32.mrf.mxu1 }
 0x858   : > { %v2333_v47 = vadd.f32 %v2272_v40, %v2212_v62  ;;  %v2349_v18 = vpack.c.bf16 %v2335_v4, %v2334_v52 }
 0x859   : > { %v4053_v54 = vpop.f32.mrf.mxu1 }
 0x85a   : > { %v2348_v53 = vpack.c.bf16 %v2333_v47, %v2332_v20  ;;  %v2338_v2 = vadd.f32 %v4053_v54, %v5497_v21 }
 0x85b   : > { %v2285_v11 = vpop.f32.mrf.mxu1 }
 0x85c   : > { %4079 = vmatprep.mubr.bf16.mxu0 %v2348_v53  ;;  %v2336_v13 = vadd.f32 %v2285_v11, %v5505_v50 }
 0x85d   : > { %v4054_v0 = vpop.f32.mrf.mxu1  ;;  %4080 = vmatmul.mubr.bf16.vlgmr.msra.gmra.mxu0 %v2349_v18 }
 0x85e   : > { %v2339_v41 = vadd.f32 %v4054_v0, %v5499_v12 }
 0x85f   : > { %v2288_v3 = vpop.f32.mrf.mxu1 }
 0x860   : > { %v2337_v24 = vadd.f32 %v2288_v3, %v5507_v39  ;;  %v2351_v62 = vpack.c.bf16 %v2339_v41, %v2338_v2 }
 0x861   : > { %v4057_v56 = vpop.f32.mrf.mxu1 }
 0x862   : > { %v2350_v37 = vpack.c.bf16 %v2337_v24, %v2336_v13  ;;  %v2342_v50 = vadd.f32 %v4057_v56, %v5481_v6  ;;  %v4365_v6 = vld [vmem:[%s5768_s5 + $0x150] sm:$0xff]  }
 0x863   : > { %v2301_v25 = vpop.f32.mrf.mxu1  ;;  %4105 = vmatprep.subr.bf16.mxu1 %v4365_v6 }
 0x864   : > { %4083 = vmatprep.mubr.bf16.mxu0 %v2350_v37  ;;  %v2340_v15 = vadd.f32 %v2301_v25, %v5489_v36  ;;  %4106 = vmatpush3.bf16.msra.mxu1 %v4365_v6 }
 0x865   : > { %v4058_v22 = vpop.f32.mrf.mxu1  ;;  %4084 = vmatmul.mubr.bf16.gmra.mxu0 %v2351_v62 }
 0x866   : > { %v2343_v14 = vadd.f32 %v4058_v22, %v5483_v55 }
 0x867   : > { %v2304_v8 = vpop.f32.mrf.mxu1 }
 0x868   : > { %v2341_v12 = vadd.f32 %v2304_v8, %v5491_v59  ;;  %v2353_v58 = vpack.c.bf16 %v2343_v14, %v2342_v50 }
 0x869   : > { %v4061_v16 = vpop.f32.mrf.mxu1 }
 0x86a   : > { %v2352_v39 = vpack.c.bf16 %v2341_v12, %v2340_v15  ;;  %v2346_v36 = vadd.f32 %v4061_v16, %v5467_v35 }
 0x86b   : > { %v2317_v21 = vpop.f32.mrf.mxu1 }
 0x86c   : > { %4087 = vmatprep.mubr.bf16.mxu0 %v2352_v39  ;;  %v2344_v9 = vadd.f32 %v2317_v21, %v5471_v57  ;;  %v4367_v57 = vld [vmem:[%s5768_s5 + $0x140] sm:$0xff]  }
 0x86d   : > { %v4062_v10 = vpop.f32.mrf.mxu1  ;;  %4088 = vmatmul.mubr.bf16.gmra.mxu0 %v2353_v58 }
 0x86e   : > { %v2347_v1 = vadd.f32 %v4062_v10, %v5469_v17  ;;  %v4366_v17 = vld [vmem:[%s5768_s5 + $0x148] sm:$0xff]  }
 0x86f   : > { %v2320_v26 = vpop.f32.mrf.mxu1  ;;  %4107 = vmatprep.subr.bf16.mxu1 %v4366_v17 }
 0x870   : > { %v2345_v55 = vadd.f32 %v2320_v26, %v5473_v19  ;;  %v2355_v59 = vpack.c.bf16 %v2347_v1, %v2346_v36  ;;  %4108 = vmatpush3.bf16.msra.mxu1 %v4366_v17 }
 0x871   : > { %4109 = vmatprep.subr.bf16.mxu1 %v4367_v57 }
 0x872   : > { %v2354_v42 = vpack.c.bf16 %v2345_v55, %v2344_v9 }
 0x874   : > { %4091 = vmatprep.mubr.bf16.mxu0 %v2354_v42  ;;  %4110 = vmatpush3.bf16.msra.mxu1 %v4367_v57 }
 0x875   : > { %4092 = vmatmul.mubr.bf16.gmra.mxu0 %v2355_v59  ;;  %4147 = vmatprep.subr.bf16.mxu1 %v5803_v7 }
 0x876   : > { %4143 = vmatprep.mubr.msk.bf16.mxu0 %vm4623_vm2, %v5803_v7 }
 0x91d   : > { %v4081_v35 = vpop.f32.mrf.mxu0 }
 0x91e   : > { %v2472_v40 = vadd.f32 %v4081_v35, %v3560_v46 }
 0x91f   : > { %v2463_v19 = vpop.f32.mrf.mxu0 }
 0x920   : > { %v2464_v63 = vadd.f32 %v3560_v46, %v2463_v19  ;;  %v2528_v11 = vmax.f32 %v2472_v40, 0.0 }
 0x921   : > { %v4082_v51 = vpop.f32.mrf.mxu0 }
 0x922   : > { %v2475_v4 = vadd.f32 %v4082_v51, %v3560_v46  ;;  %v2526_v53 = vmax.f32 %v2464_v63, 0.0 }
 0x923   : > { %v2466_v20 = vpop.f32.mrf.mxu0 }
 0x924   : > { %v2467_v47 = vadd.f32 %v3560_v46, %v2466_v20  ;;  %v2529_v52 = vmax.f32 %v2475_v4, 0.0 }
 0x925   : > { %v4085_v54 = vpop.f32.mrf.mxu0 }
 0x926   : > { %v2527_v18 = vmax.f32 %v2467_v47, 0.0  ;;  %v2543_v3 = vpack.c.bf16 %v2529_v52, %v2528_v11  ;;  %v2488_v56 = vadd.f32 %v4085_v54, %v3560_v46  ;;  %v4368_v11 = vld [vmem:[#allocation8 + $0x38] sm:$0xff]  }
 0x927   : > { %v2479_v0 = vpop.f32.mrf.mxu0 }
 0x928   : > { %v2542_v41 = vpack.c.bf16 %v2527_v18, %v2526_v53  ;;  %v2480_v24 = vadd.f32 %v3560_v46, %v2479_v0  ;;  %v2532_v15 = vmax.f32 %v2488_v56, 0.0  ;;  %v4369_v0 = vld [vmem:[#allocation8 + $0x30] sm:$0xff]  }
 0x929   : > { %v4086_v13 = vpop.f32.mrf.mxu0 }
 0x92a   : > { %v2491_v2 = vadd.f32 %v4086_v13, %v3560_v46  ;;  %4111 = vmatprep.mubr.bf16.mxu1 %v2542_v41  ;;  %v2530_v14 = vmax.f32 %v2480_v24, 0.0 }
 0x92b   : > { %v2482_v37 = vpop.f32.mrf.mxu0  ;;  %4112 = vmatmul.mubr.bf16.vlgmr.msra.gmra.mxu1 %v2543_v3  ;;  %v5575_v3 = vld [vmem:[#allocation5 + $0x5] ss:$0 sm:$0xff] }
 0x92c   : > { %v2483_v62 = vadd.f32 %v3560_v46, %v2482_v37  ;;  %v2533_v25 = vmax.f32 %v2491_v2, 0.0  ;;  %4148 = vmatpush3.bf16.msra.mxu1 %v4368_v11  ;;  %v4371_v2 = vld [vmem:[#allocation8 + $0x20] sm:$0xff]  }
 0x92d   : > { %v4089_v22 = vpop.f32.mrf.mxu0  ;;  %4149 = vmatprep.subr.bf16.mxu1 %v5803_v7 }
 0x92e   : > { %v2531_v8 = vmax.f32 %v2483_v62, 0.0  ;;  %v2545_v16 = vpack.c.bf16 %v2533_v25, %v2532_v15  ;;  %v2504_v10 = vadd.f32 %v4089_v22, %v3560_v46 }
 0x92f   : > { %v2495_v12 = vpop.f32.mrf.mxu0 }
 0x930   : > { %v2544_v50 = vpack.c.bf16 %v2531_v8, %v2530_v14  ;;  %v2496_v58 = vadd.f32 %v3560_v46, %v2495_v12  ;;  %v2536_v59 = vmax.f32 %v2504_v10, 0.0  ;;  %4150 = vmatpush3.bf16.msra.mxu1 %v4369_v0  ;;  %v4372_v8 = vld [vmem:[#allocation8 + $0x18] sm:$0xff]  }
 0x931   : > { %v4090_v39 = vpop.f32.mrf.mxu0  ;;  %4151 = vmatprep.subr.bf16.mxu1 %v5803_v7 }
 0x932   : > { %v2507_v21 = vadd.f32 %v4090_v39, %v3560_v46  ;;  %4115 = vmatprep.mubr.bf16.mxu1 %v2544_v50  ;;  %v2534_v36 = vmax.f32 %v2496_v58, 0.0 }
 0x933   : > { %v2498_v1 = vpop.f32.mrf.mxu0  ;;  %4116 = vmatmul.mubr.bf16.gmra.mxu1 %v2545_v16 }
 0x934   : > { %v2499_v26 = vadd.f32 %v3560_v46, %v2498_v1  ;;  %v2537_v9 = vmax.f32 %v2507_v21, 0.0  ;;  %v4373_v1 = vld [vmem:[#allocation8 + $0x10] sm:$0xff]  }
 0x935   : > { %v4093_v55 = vpop.f32.mrf.mxu0 }
 0x936   : > { %v2535_v42 = vmax.f32 %v2499_v26, 0.0  ;;  %v2547_v57 = vpack.c.bf16 %v2537_v9, %v2536_v59  ;;  %v2520_v63 = vadd.f32 %v4093_v55, %v3560_v46 }
 0x937   : > { %v2511_v6 = vpop.f32.mrf.mxu0 }
 0x938   : > { %v2546_v17 = vpack.c.bf16 %v2535_v42, %v2534_v36  ;;  %v2512_v19 = vadd.f32 %v3560_v46, %v2511_v6  ;;  %v2540_v54 = vmax.f32 %v2520_v63, 0.0 }
 0x939   : > { %v4094_v35 = vpop.f32.mrf.mxu0 }
 0x93a   : > { %v2523_v51 = vadd.f32 %v4094_v35, %v3560_v46  ;;  %4119 = vmatprep.mubr.bf16.mxu1 %v2546_v17  ;;  %v2538_v47 = vmax.f32 %v2512_v19, 0.0  ;;  %v4374_v35 = vld [vmem:[#allocation8 + $0x8] sm:$0xff]  }
 0x93b   : > { %v2514_v4 = vpop.f32.mrf.mxu0  ;;  %4120 = vmatmul.mubr.bf16.gmra.mxu1 %v2547_v57 }
 0x93c   : > { %v2515_v40 = vadd.f32 %v3560_v46, %v2514_v4  ;;  %v2541_v20 = vmax.f32 %v2523_v51, 0.0  ;;  %v4370_v46 = vld [vmem:[#allocation8 + $0x28] sm:$0xff]  }
 0x93d   : > { %4152 = vmatpush3.bf16.msra.mxu1 %v4370_v46 }
 0x93e   : > { %v2539_v52 = vmax.f32 %v2515_v40, 0.0  ;;  %v2549_v18 = vpack.c.bf16 %v2541_v20, %v2540_v54  ;;  %4153 = vmatprep.subr.bf16.mxu1 %v5803_v7 }
 0x940   : > { %v2548_v53 = vpack.c.bf16 %v2539_v52, %v2538_v47 }
 0x941   : > { %4154 = vmatpush3.bf16.msra.mxu1 %v4371_v2 }
 0x942   : > { %4123 = vmatprep.mubr.bf16.mxu1 %v2548_v53  ;;  %4155 = vmatprep.subr.bf16.mxu1 %v5803_v7 }
 0x943   : > { %4124 = vmatmul.mubr.bf16.gmra.mxu1 %v2549_v18 }
 0x944   : > { %4163 = vmatprep.mubr.msk.bf16.mxu1 %vm4623_vm2, %v5803_v7 }
 0x945   : > { %4156 = vmatpush3.bf16.msra.mxu1 %v4372_v8 }
 0x946   : > { %4157 = vmatprep.subr.bf16.mxu1 %v5803_v7 }
 0x949   : > { %4158 = vmatpush3.bf16.msra.mxu1 %v4373_v1 }
 0x94a   : > { %4159 = vmatprep.subr.bf16.mxu1 %v5803_v7 }
 0x94d   : > { %4160 = vmatpush3.bf16.msra.mxu1 %v4374_v35 }
 0x94e   : > { %4161 = vmatprep.subr.bf16.mxu1 %v5803_v7 }
 0x9eb   : > { %v4113_v41 = vpop.f32.mrf.mxu1 }
 0x9ec   : > { %v5582_v37 = vadd.f32 %v4113_v41, %v5575_v3 }
 0x9ed   : > { %v2657_v13 = vpop.f32.mrf.mxu1 }
 0x9ee   : > { %v5578_v24 = vadd.f32 %v5575_v3, %v2657_v13  ;;  %v2722_v12 = vmul.f32 %v5582_v37, %v5115_v30 }
 0x9ef   : > { %v4114_v56 = vpop.f32.mrf.mxu1 }
 0x9f0   : > { %v5585_v62 = vadd.f32 %v4114_v56, %v5575_v3  ;;  %v2720_v22 = vmul.f32 %v5578_v24, %v5111_v28 }
 0x9f1   : > { %v2660_v25 = vpop.f32.mrf.mxu1 }
 0x9f2   : > { %v5590_v14 = vadd.f32 %v5575_v3, %v2660_v25  ;;  %v2723_v16 = vmul.f32 %v5585_v62, %v5117_v31  ;;  %v2757_v28 = vmul.f32 %v2720_v22, %v5578_v24 }
 0x9f3   : > { %v4117_v15 = vpop.f32.mrf.mxu1 }
 0x9f4   : > { %v2721_v50 = vmul.f32 %v5590_v14, %v5113_v29  ;;  %v5605_v26 = vadd.f32 %v4117_v15, %v5575_v3  ;;  %v2759_v29 = vmul.f32 %v2722_v12, %v5582_v37  ;;  %v2760_v36 = vmul.f32 %v2723_v16, %v5585_v62 }
 0x9f5   : > { %v2673_v39 = vpop.f32.mrf.mxu1 }
 0x9f6   : > { %v2736_v58 = vadd.f32 %v2721_v50, %v2720_v22  ;;  %v2758_v21 = vmul.f32 %v2721_v50, %v5590_v14  ;;  %v5602_v10 = vadd.f32 %v5575_v3, %v2673_v39  ;;  %v2726_v19 = vmul.f32 %v5605_v26, %v5123_v27 }
 0x9f7   : > { %v4118_v30 = vpop.f32.mrf.mxu1 }
 0x9f8   : > { %v2737_v31 = vadd.f32 %v2736_v58, %v2722_v12  ;;  %v2773_v9 = vadd.f32 %v2758_v21, %v2757_v28  ;;  %v2724_v55 = vmul.f32 %v5602_v10, %v5119_v32  ;;  %v5613_v17 = vadd.f32 %v4118_v30, %v5575_v3 }
 0x9f9   : > { %v2676_v42 = vpop.f32.mrf.mxu1 }
 0x9fa   : > { %v2774_v59 = vadd.f32 %v2773_v9, %v2759_v29  ;;  %v2738_v6 = vadd.f32 %v2737_v31, %v2723_v16  ;;  %v5616_v57 = vadd.f32 %v5575_v3, %v2676_v42  ;;  %v2761_v63 = vmul.f32 %v2724_v55, %v5602_v10 }
 0x9fb   : > { %v4121_v51 = vpop.f32.mrf.mxu1  ;;  %v2727_v52 = vmul.f32 %v5613_v17, %v5125_v34 }
 0x9fc   : > { %v2739_v32 = vadd.f32 %v2738_v6, %v2724_v55  ;;  %v2775_v4 = vadd.f32 %v2774_v59, %v2760_v36  ;;  %v2725_v40 = vmul.f32 %v5616_v57, %v5121_v33  ;;  %v5628_v27 = vadd.f32 %v4121_v51, %v5575_v3 }
 0x9fd   : > { %v2689_v20 = vpop.f32.mrf.mxu1  ;;  %v2763_v33 = vmul.f32 %v2726_v19, %v5605_v26  ;;  %v2764_v2 = vmul.f32 %v2727_v52, %v5613_v17 }
 0x9fe   : > { %v2776_v47 = vadd.f32 %v2775_v4, %v2761_v63  ;;  %v2740_v54 = vadd.f32 %v2739_v32, %v2725_v40  ;;  %v2762_v53 = vmul.f32 %v2725_v40, %v5616_v57  ;;  %v5631_v18 = vadd.f32 %v5575_v3, %v2689_v20 }
 0x9ff   : > { %v4122_v11 = vpop.f32.mrf.mxu1  ;;  %v2730_v8 = vmul.f32 %v5628_v27, %v5145_v48 }
 0xa00   : > { %v2741_v0 = vadd.f32 %v2740_v54, %v2726_v19  ;;  %v2777_v46 = vadd.f32 %v2776_v47, %v2762_v53  ;;  %v2728_v34 = vmul.f32 %v5631_v18, %v5195_v44  ;;  %v5638_v41 = vadd.f32 %v4122_v11, %v5575_v3 }
 0xa01   : > { %v2692_v13 = vpop.f32.mrf.mxu1  ;;  %v2767_v29 = vmul.f32 %v2730_v8, %v5628_v27 }
 0xa02   : > { %v2778_v56 = vadd.f32 %v2777_v46, %v2763_v33  ;;  %v2742_v25 = vadd.f32 %v2741_v0, %v2727_v52  ;;  %v5642_v22 = vadd.f32 %v5575_v3, %v2692_v13  ;;  %v2765_v50 = vmul.f32 %v2728_v34, %v5631_v18 }
 0xa03   : > { %v4125_v15 = vpop.f32.mrf.mxu1  ;;  %v2731_v39 = vmul.f32 %v5638_v41, %v5165_v61 }
 0xa04   : > { %v2743_v12 = vadd.f32 %v2742_v25, %v2728_v34  ;;  %v2779_v16 = vadd.f32 %v2778_v56, %v2764_v2  ;;  %v2729_v44 = vmul.f32 %v5642_v22, %v5129_v38  ;;  %v2714_v38 = vadd.f32 %v4125_v15, %v5575_v3 }
 0xa05   : > { %v2705_v28 = vpop.f32.mrf.mxu1  ;;  %v2768_v61 = vmul.f32 %v2731_v39, %v5638_v41 }
 0xa06   : > { %v2780_v58 = vadd.f32 %v2779_v16, %v2765_v50  ;;  %v2744_v21 = vadd.f32 %v2743_v12, %v2729_v44  ;;  %v2766_v1 = vmul.f32 %v2729_v44, %v5642_v22  ;;  %v5653_v30 = vadd.f32 %v5575_v3, %v2705_v28 }
 0xa07   : > { %v4126_v48 = vpop.f32.mrf.mxu1  ;;  %v2734_v63 = vmul.f32 %v2714_v38, %v5236_v5 }
 0xa08   : > { %v2745_v31 = vadd.f32 %v2744_v21, %v2730_v8  ;;  %v2781_v9 = vadd.f32 %v2780_v58, %v2766_v1  ;;  %v2732_v55 = vmul.f32 %v5653_v30, %v5193_v43  ;;  %v2717_v6 = vadd.f32 %v4126_v48, %v5575_v3  ;;  %v3594_v21 = vld [vmem:[%s5770_s7 + $0x2] sm:$0x1] }
 0xa09   : > { %v2708_v36 = vpop.f32.mrf.mxu1  ;;  %v2771_v52 = vmul.f32 %v2734_v63, %v2714_v38 }
 0xa0a   : > { %v2782_v42 = vadd.f32 %v2781_v9, %v2767_v29  ;;  %v2746_v59 = vadd.f32 %v2745_v31, %v2731_v39  ;;  %v2709_v35 = vadd.f32 %v5575_v3, %v2708_v36  ;;  %v2769_v51 = vmul.f32 %v2732_v55, %v5653_v30  ;;  %v2805_v29 = vld [vmem:[#allocation7 + $0x2] sm:$0x1] }
 0xa0b   : > { %v2735_v40 = vmul.f32 %v2717_v6, %v5241_v60 }
 0xa0c   : > { %v2747_v19 = vadd.f32 %v2746_v59, %v2732_v55  ;;  %v2783_v32 = vadd.f32 %v2782_v42, %v2768_v61  ;;  %v2733_v4 = vmul.f32 %v2709_v35, %v5220_v45 }
 0xa0d   : > { %v2772_v11 = vmul.f32 %v2735_v40, %v2717_v6 }
 0xa0e   : > { %v2784_v43 = vadd.f32 %v2783_v32, %v2769_v51  ;;  %v2748_v20 = vadd.f32 %v2747_v19, %v2733_v4  ;;  %v2770_v47 = vmul.f32 %v2733_v4, %v2709_v35 }
 0xa10   : > { %v2749_v54 = vadd.f32 %v2748_v20, %v2734_v63  ;;  %v2785_v53 = vadd.f32 %v2784_v43, %v2770_v47 }
 0xa12   : > { %v2750_v33 = vadd.f32 %v2749_v54, %v2735_v40  ;;  %v2786_v0 = vadd.f32 %v2785_v53, %v2771_v52 }
 0xa14   : > { %v2751_v3 = vrot.slane %v2750_v33, 4  ;;  %v2787_v46 = vadd.f32 %v2786_v0, %v2772_v11 }
 0xa16   : > { %v2752_v34 = vadd.f32 %v2751_v3, %v2750_v33  ;;  %v2788_v13 = vrot.slane %v2787_v46, 4 }
 0xa18   : > { %v2753_v2 = vrot.slane %v2752_v34, 2  ;;  %v2789_v56 = vadd.f32 %v2788_v13, %v2787_v46 }
 0xa1a   : > { %v2754_v5 = vadd.f32 %v2753_v2, %v2752_v34  ;;  %v2790_v25 = vrot.slane %v2789_v56, 2 }
 0xa1c   : > { %v2755_v45 = vrot.slane %v2754_v5, 1  ;;  %v2791_v8 = vadd.f32 %v2790_v25, %v2789_v56  ;;  %v4377_v25 = vld [vmem:[#allocation8 + $0x70] sm:$0xff]  }
 0xa1e   : > { %v2756_v15 = vadd.f32 %v2755_v45, %v2754_v5  ;;  %v2792_v60 = vrot.slane %v2791_v8, 1  ;;  %v4378_v45 = vld [vmem:[#allocation8 + $0x68] sm:$0xff]  }
 0xa20   : > { %v2793_v12 = vadd.f32 %v2792_v60, %v2791_v8  ;;  %v2794_v50 = vmul.f32 %v2756_v15, %v5244_v49  ;;  %v4379_v8 = vld [vmem:[#allocation8 + $0x60] sm:$0xff]   ;;  %v4380_v15 = vld [vmem:[#allocation8 + $0x58] sm:$0xff]   ;;  %v4381_v60 = vld [vmem:[#allocation8 + $0x50] sm:$0xff]  }
 0xa22   : > { %v2795_v16 = vmul.f32 %v2793_v12, %v5244_v49  ;;  %v2796_v44 = vmul.f32 %v2794_v50, %v2794_v50 }
 0xa24   : > { %v2797_v39 = vsub.f32 %v2795_v16, %v2796_v44 }
 0xa26   : > { %v2798_v28 = vmax.f32 %v2797_v39, 0.0 }
 0xa28   : > { %v2801_v58 = vadd.f32 1e-05, %v2798_v28  ;;  %v4382_v28 = vld [vmem:[#allocation8 + $0x48] sm:$0xff]  }
 0xa2a   : > { %4398 = vrsqrt.f32 %v2801_v58  ;;  %v4383_v58 = vld [vmem:[#allocation8 + $0x40] sm:$0xff]  }
 0xa37   : > { %v4399_v1 = vpop.eup %4398 }
 0xa38   : > { %v2803_v48 = vmul.f32 %v4399_v1, %v3594_v21  ;;  %v4384_v21 = vld [vmem:[#allocation8 + $0xb8] sm:$0xff]   ;;  %v4385_v1 = vld [vmem:[#allocation8 + $0xb0] sm:$0xff]  }
 0xa3a   : > { %v2806_v31 = vmul.f32 %v2803_v48, %v2794_v50  ;;  %v2812_v9 = vrot.slane %v2803_v48, %v5252_v23  ;;  %v4386_v48 = vld [vmem:[#allocation8 + $0xa8] sm:$0xff]  }
 0xa3c   : > { %v2807_v55 = vsub.f32 %v2805_v29, %v2806_v31  ;;  %v2828_v61 = vmul.f32 %v2812_v9, %v2714_v38  ;;  %v2829_v49 = vmul.f32 %v2812_v9, %v2717_v6  ;;  %v2822_v42 = vmul.f32 %v2812_v9, %v5631_v18  ;;  %v4387_v29 = vld [vmem:[#allocation8 + $0xa0] sm:$0xff]   ;;  %v4388_v31 = vld [vmem:[#allocation8 + $0x98] sm:$0xff]  }
 0xa3d   : > { %v2823_v59 = vmul.f32 %v2812_v9, %v5642_v22  ;;  %v2827_v19 = vmul.f32 %v2812_v9, %v2709_v35  ;;  %v2826_v63 = vmul.f32 %v2812_v9, %v5653_v30  ;;  %v2825_v38 = vmul.f32 %v2812_v9, %v5638_v41 }
 0xa3e   : > { %v2834_v36 = vrot.slane %v2807_v55, %v5252_v23  ;;  %v2824_v23 = vmul.f32 %v2812_v9, %v5628_v27  ;;  %v2820_v35 = vmul.f32 %v2812_v9, %v5605_v26  ;;  %v2821_v54 = vmul.f32 %v2812_v9, %v5613_v17  ;;  %v3595_v55 = vld [vmem:[#allocation10] ss:$0 sm:$0xff] }
 0xa3f   : > { %v2818_v41 = vmul.f32 %v2812_v9, %v5602_v10  ;;  %v2819_v11 = vmul.f32 %v2812_v9, %v5616_v57  ;;  %v2816_v26 = vmul.f32 %v2812_v9, %v5582_v37  ;;  %v2817_v17 = vmul.f32 %v2812_v9, %v5585_v62  ;;  %v2860_v62 = vld [vmem:[%s514_s28] sm:$0xf] }
 0xa40   : > { %v2850_v51 = vadd.f32 %v2834_v36, %v2828_v61  ;;  %v2851_v32 = vadd.f32 %v2834_v36, %v2829_v49  ;;  %v2844_v4 = vadd.f32 %v2834_v36, %v2822_v42  ;;  %v2845_v43 = vadd.f32 %v2834_v36, %v2823_v59 }
 0xa41   : > { %v2849_v40 = vadd.f32 %v2834_v36, %v2827_v19  ;;  %v2848_v47 = vadd.f32 %v2834_v36, %v2826_v63  ;;  %v2846_v22 = vadd.f32 %v2834_v36, %v2824_v23  ;;  %v2847_v6 = vadd.f32 %v2834_v36, %v2825_v38  ;;  %v4391_v63 = vld [vmem:[#allocation8 + $0x80] sm:$0xff]  }
 0xa42   : > { %v2859_v20 = vpack.c.bf16 %v2851_v32, %v2850_v51  ;;  %v2856_v52 = vpack.c.bf16 %v2845_v43, %v2844_v4  ;;  %v2842_v53 = vadd.f32 %v2834_v36, %v2820_v35  ;;  %v2843_v27 = vadd.f32 %v2834_v36, %v2821_v54  ;;  %v4390_v32 = vld [vmem:[#allocation8 + $0x88] sm:$0xff]   ;;  %v3604_v4 = vld [vmem:[#allocation10 + $0x1] ss:$0 sm:$0xff] }
 0xa43   : > { %v2858_v18 = vpack.c.bf16 %v2849_v40, %v2848_v47  ;;  %v2857_v30 = vpack.c.bf16 %v2847_v6, %v2846_v22  ;;  %v2840_v0 = vadd.f32 %v2834_v36, %v2818_v41  ;;  %v2841_v3 = vadd.f32 %v2834_v36, %v2819_v11 }
 0xa44   : > { %4128 = vmatpush3.bf16.msra.mxu0 %v2859_v20  ;;  %v2855_v33 = vpack.c.bf16 %v2843_v27, %v2842_v53  ;;  %v2838_v34 = vadd.f32 %v2834_v36, %v2816_v26  ;;  %v2839_v13 = vadd.f32 %v2834_v36, %v2817_v17  ;;  %v2814_v10 = vmul.f32 %v2812_v9, %v5578_v24  ;;  %v4375_v24 = vld [vmem:[#allocation8] sm:$0xff]  }
 0xa45   : > { %4129 = vmatprep.subr.bf16.mxu0 %v5803_v7  ;;  %v2854_v46 = vpack.c.bf16 %v2841_v3, %v2840_v0  ;;  %v2815_v57 = vmul.f32 %v2812_v9, %v5590_v14  ;;  %4162 = vmatpush3.bf16.msra.mxu1 %v4375_v24  ;;  %v4376_v14 = vld [vmem:[#allocation8 + $0x78] sm:$0xff]   ;;  %v4389_v9 = vld [vmem:[#allocation8 + $0x90] sm:$0xff]  }
 0xa46   : > { %v2853_v2 = vpack.c.bf16 %v2839_v13, %v2838_v34  ;;  %v2836_v56 = vadd.f32 %v2834_v36, %v2814_v10  ;;  %4187 = vmatprep.subr.bf16.mxu1 %v5803_v7 }
 0xa47   : > { %v2837_v5 = vadd.f32 %v2834_v36, %v2815_v57 }
 0xa48   : > { %4130 = vmatpush3.bf16.msra.mxu0 %v2858_v18  ;;  %v3613_v18 = vld [vmem:[#allocation10 + $0x2] ss:$0 sm:$0xff] }
 0xa49   : > { %4131 = vmatprep.subr.bf16.mxu0 %v5803_v7  ;;  %v2852_v37 = vpack.c.bf16 %v2837_v5, %v2836_v56 }
 0xa4c   : > { %4132 = vmatpush3.bf16.msra.mxu0 %v2857_v30 }
 0xa4d   : > { %4133 = vmatprep.subr.bf16.mxu0 %v5803_v7 }
 0xa50   : > { %4134 = vmatpush3.bf16.msra.mxu0 %v2856_v52 }
 0xa51   : > { %4135 = vmatprep.subr.bf16.mxu0 %v5803_v7 }
 0xa54   : > { %4136 = vmatpush3.bf16.msra.mxu0 %v2855_v33 }
 0xa55   : > { %4137 = vmatprep.subr.bf16.mxu0 %v5803_v7 }
 0xa58   : > { %4138 = vmatpush3.bf16.msra.mxu0 %v2854_v46 }
 0xa59   : > { %4139 = vmatprep.subr.bf16.mxu0 %v5803_v7 }
 0xa5c   : > { %4140 = vmatpush3.bf16.msra.mxu0 %v2853_v2 }
 0xa5d   : > { %4141 = vmatprep.subr.bf16.mxu0 %v5803_v7 }
 0xa60   : > { %4142 = vmatpush3.bf16.msra.mxu0 %v2852_v37 }
 0xa61   : > { %4167 = vmatprep.subr.bf16.mxu0 %v5803_v7 }
 0xa63   : > { %4144 = vmatmul.mubr.bf16.vlgmr.msra.gmra.mxu0 %v2860_v62 }
 0xa64   : > { %4183 = vmatprep.mubr.msk.bf16.mxu0 %vm4623_vm2, %v5803_v7  ;;  %4168 = vmatpush3.bf16.msra.mxu0 %v4376_v14 }
 0xa65   : > { %4169 = vmatprep.subr.bf16.mxu0 %v5803_v7 }
 0xa68   : > { %4170 = vmatpush3.bf16.msra.mxu0 %v4377_v25 }
 0xa69   : > { %4171 = vmatprep.subr.bf16.mxu0 %v5803_v7 }
 0xa6c   : > { %4172 = vmatpush3.bf16.msra.mxu0 %v4378_v45 }
 0xa6d   : > { %4173 = vmatprep.subr.bf16.mxu0 %v5803_v7 }
 0xa70   : > { %4174 = vmatpush3.bf16.msra.mxu0 %v4379_v8 }
 0xa71   : > { %4175 = vmatprep.subr.bf16.mxu0 %v5803_v7 }
 0xa74   : > { %4176 = vmatpush3.bf16.msra.mxu0 %v4380_v15 }
 0xa75   : > { %4177 = vmatprep.subr.bf16.mxu0 %v5803_v7 }
 0xa78   : > { %4178 = vmatpush3.bf16.msra.mxu0 %v4381_v60 }
 0xa79   : > { %4179 = vmatprep.subr.bf16.mxu0 %v5803_v7 }
 0xa7c   : > { %4180 = vmatpush3.bf16.msra.mxu0 %v4382_v28 }
 0xa7d   : > { %4181 = vmatprep.subr.bf16.mxu0 %v5803_v7 }
 0xa80   : > { %4182 = vmatpush3.bf16.msra.mxu0 %v4383_v58 }
 0xb23   : > { %v2895_v12 = vpop.f32.mrf.mxu0 }
 0xb24   : > { %v2901_v50 = vpack.c.bf16 %v2895_v12, %v2895_v12 }
 0xb25   : > { %v4145_v16 = vpop.f32.mrf.mxu0 }
 0xb26   : > { %4164 = vmatmul.mubr.bf16.vlgmr.msra.gmra.mxu1 %v2901_v50 }
 0xb27   : > { %v2898_v44 = vpop.f32.mrf.mxu0  ;;  %4203 = vmatprep.mubr.msk.bf16.mxu1 %vm4623_vm2, %v5803_v7  ;;  %4188 = vmatpush3.bf16.msra.mxu1 %v4384_v21 }
 0xb28   : > { %4189 = vmatprep.subr.bf16.mxu1 %v5803_v7 }
 0xb29   : > { %v4146_v39 = vpop.f32.mrf.mxu0 }
 0xb2b   : > { %4190 = vmatpush3.bf16.msra.mxu1 %v4385_v1 }
 0xb2c   : > { %4191 = vmatprep.subr.bf16.mxu1 %v5803_v7 }
 0xb2f   : > { %4192 = vmatpush3.bf16.msra.mxu1 %v4386_v48 }
 0xb30   : > { %4193 = vmatprep.subr.bf16.mxu1 %v5803_v7 }
 0xb33   : > { %4194 = vmatpush3.bf16.msra.mxu1 %v4387_v29 }
 0xb34   : > { %4195 = vmatprep.subr.bf16.mxu1 %v5803_v7 }
 0xb37   : > { %4196 = vmatpush3.bf16.msra.mxu1 %v4388_v31 }
 0xb38   : > { %4197 = vmatprep.subr.bf16.mxu1 %v5803_v7 }
 0xb3b   : > { %4198 = vmatpush3.bf16.msra.mxu1 %v4389_v9 }
 0xb3c   : > { %4199 = vmatprep.subr.bf16.mxu1 %v5803_v7 }
 0xb3f   : > { %4200 = vmatpush3.bf16.msra.mxu1 %v4390_v32 }
 0xb40   : > { %4201 = vmatprep.subr.bf16.mxu1 %v5803_v7 }
 0xb43   : > { %4202 = vmatpush3.bf16.msra.mxu1 %v4391_v63 }
 0xbe6   : > { %v3007_v36 = vpop.f32.mrf.mxu1 }
 0xbe7   : > { %v3008_v61 = vadd.f32 %v3595_v55, %v3007_v36 }
 0xbe8   : > { %v4165_v49 = vpop.f32.mrf.mxu1 }
 0xbe9   : > { %v3013_v42 = vmax.f32 %v3008_v61, 0.0 }
 0xbea   : > { %v3010_v59 = vpop.f32.mrf.mxu1 }
 0xbeb   : > { %v3014_v19 = vpack.c.bf16 %v3013_v42, %v3013_v42 }
 0xbec   : > { %v4166_v51 = vpop.f32.mrf.mxu1 }
 0xbed   : > { %4184 = vmatmul.mubr.bf16.vlgmr.msra.gmra.mxu0 %v3014_v19 }
 0xcad   : > { %v3122_v43 = vpop.f32.mrf.mxu0 }
 0xcae   : > { %v3123_v40 = vadd.f32 %v3604_v4, %v3122_v43 }
 0xcaf   : > { %v4185_v20 = vpop.f32.mrf.mxu0 }
 0xcb0   : > { %v3128_v47 = vmax.f32 %v3123_v40, 0.0 }
 0xcb1   : > { %v3125_v52 = vpop.f32.mrf.mxu0 }
 0xcb2   : > { %v3129_v23 = vpack.c.bf16 %v3128_v47, %v3128_v47 }
 0xcb3   : > { %v4186_v38 = vpop.f32.mrf.mxu0 }
 0xcb4   : > { %4204 = vmatmul.mubr.bf16.vlgmr.msra.gmra.mxu1 %v3129_v23 }
 0xd74   : > { %v3237_v22 = vpop.f32.mrf.mxu1 }
 0xd75   : > { %v3238_v6 = vadd.f32 %v3613_v18, %v3237_v22 }
 0xd76   : > { %v4205_v7 = vpop.f32.mrf.mxu1 }
 0xd77   : > { %3243 = vst [vmem:[%s495_s30] sm:$0xff] %v3238_v6 }
 0xd78   : > { %v3240_v30 = vpop.f32.mrf.mxu1 }
 0xd79   : > { %4551 = shalt.err (!%p4548_p13)
}
 0xd7a   : > { %s4552_s19 = scalar_lea.hbm %s5722_s16, 128  ;;  %s4556_s22 = scalar_lea.hbm %s5774_s11, 256 }
 0xd7b   : > { %p4553_p9 = scmp.ne.s32.totalorder %s5722_s16, %s4552_s19  ;;  %p4557_p0 = scmp.lt.s32.totalorder %s5722_s16, %s5774_s11 }
 0xd7c   : > { %p4558_p12 = scmp.lt.s32.totalorder %s4556_s22, %s4552_s19 }
 0xd7d   : > { %p4554_p8 = pnand %p4553_p9, %p4723_p5 }
 0xd7e   : > { %p4559_p10 = por %p4558_p12, %p4557_p0 }
 0xd7f   : > { %p4555_p11 = pneg %p4554_p8 }
 0xd81   : > { %p4560_p2 = pnand %p4559_p10, %p4555_p11 }
 0xd83   : > { %4563 = shalt.err (!%p4560_p2)
}
 0xd84   : > { %4231 = dma.vmem_to_hbm [thread:$0]  (%p4723_p5), %s5724_s12, 128, %s5722_s16, %s3245_s24   ;;  %v4206_v35 = vpop.f32.mrf.mxu1 }
 0xd85 PF: > { %s5804_s25 = sld [smem:[#allocation19_spill]]  ;;  %p4263_p1 = scmp.ge.s32.totalorder %s4610_s20, 2 }
 0xd86   : > { %s3270_s13 = sand.u32 1, %s4598_s17  }
 0xd87   : > { %s3271_s15 = scalar_lea.sflag [#allocation4], %s3270_s13 }
 0xd8b   : > { %p5805_p3 = scmp.ne.s32.totalorder %s5804_s25, 0 }
 0xd8d   : > { %p4250_p4 = pnand %p4263_p1, %p5805_p3 }
 0xd8f   : > { %p4251_p7 = pneg %p4250_p4 }
 0xd91   : > { %4593 = dma.done.wait (%p4251_p7), %s3271_s15, 128  }
 0xd92   : > { %4595 = vsyncadd (%p4251_p7), %s3271_s15, 4294967168  ;;  %s5806_s20 = sld [smem:[#allocation17_spill]]  ;;  %s5809_s17 = smov %s4602_s18 }
 0xd93   : > { %s5807_s21 = sld [smem:[#allocation16_spill]] }
 0xd94   : > { %s5808_s19 = sld [smem:[#allocation18_spill]] }
 0xd98   : > { %p24_p6 = scmp.ge.s32.totalorder %s5806_s20, 4  }
 0xd99   : > { %s5810_s18 = smov %s5807_s21 }
 0xd9a   :  { %26 = sbr.rel (!%p24_p6) target bundleno = 6 (0x6), region = 147 }
 0xd9f   :  { %3276 = vsyncpa [#allocation3], 1 }
 0xda0   :  { %3278 = vsyncpa [#allocation3 + $0x1], 1 }
 0xda1   :  { %3279 = vsyncpa [#allocation6], 1 }
 0xda2   :  { %3280 = vsyncpa [#allocation9], 1 }
 0xda3   :  { %3281 = vsyncpa [#allocation4], 1 }
 0xda4   :  { %3283 = vsyncpa [#allocation4 + $0x1], 1 }

</bundles_post_ra>
